<compile_context>
chip_gen: v6e
topology: v6e:2x2x1
jax: 0.10.0
libtpu: 0.0.40
codegen_flags: <defaults>
</compile_context>

<pallas_src>
import functools

import jax
import jax.numpy as jnp
from jax import lax
from jax.experimental import pallas as pl
from jax.experimental.pallas import tpu as pltpu

EPS = 1e-5
NEG_SLOPE = 0.1


def _leaky(x):
    return jnp.maximum(x, NEG_SLOPE * x)


def resblock_kernel(x_ref, w1_ref, w2_ref, mask_ref,
                    g1_ref, be1_ref, g2_ref, be2_ref,
                    o_ref,
                    h1_scr, h2_scr, stat1, aff1, stat2, aff2,
                    *, W, mm_dtype):
    """Channels-major fused residual block, gridded as (phase, image).

    x_ref   : (1, Cin , HW)   per-image NCHW block, spatial flattened (lane axis)
    w1_ref  : (Cmid, Cin)     1x1 conv weight (mm_dtype)
    w2_ref  : (9, Cout, Cmid) 3x3 conv weight, tap-major (ky, kx) (mm_dtype)
    mask_ref: (9, 1, HW)      0/1 validity mask per tap (f32)
    g*/be*  : (C, 1)          BatchNorm affine parameters (f32)
    o_ref   : (1, Cout, HW)
    h1_scr  : (N, Cmid, HW)   conv1 output staging (mm_dtype)
    h2_scr  : (N, Cout, HW)   conv2 output staging (f32)
    stat*   : (2, C, 1)       [sum, sum-of-squares] accumulators (f32)
    aff*    : (2, C, 1)       [scale, shift] for the fused BN+leaky apply (f32)
    """
    phase = pl.program_id(0)
    n = pl.program_id(1)
    N, Cmid, HW = h1_scr.shape
    Cout = h2_scr.shape[1]
    inv_count = 1.0 / (N * HW)          # biased variance, matches PyTorch BN

    # ------------------ phase 0 : conv1 (1x1) + BN1 statistics ------------------
    @pl.when((phase == 0) & (n == 0))
    def _init_stats1():
        stat1[...] = jnp.zeros_like(stat1)

    @pl.when(phase == 0)
    def _conv1():
        xn = x_ref[0].astype(mm_dtype)                                  # (Cin, HW)
        h1 = jnp.dot(w1_ref[...], xn, preferred_element_type=jnp.float32)
        # Per-channel lane reductions ride the XLU while the MXU is busy.
        stat1[0] += jnp.sum(h1, axis=1, keepdims=True)
        stat1[1] += jnp.sum(h1 * h1, axis=1, keepdims=True)
        h1_scr[n] = h1.astype(h1_scr.dtype)

    # --------- phase 1 : fused BN1+leaky -> conv2 (3x3) + BN2 statistics --------
    @pl.when((phase == 1) & (n == 0))
    def _finalize_bn1_init_stats2():
        mean = stat1[0] * inv_count
        var = jnp.maximum(stat1[1] * inv_count - mean * mean, 0.0)
        scale = g1_ref[...] * lax.rsqrt(var + EPS)
        aff1[0] = scale
        aff1[1] = be1_ref[...] - mean * scale
        stat2[...] = jnp.zeros_like(stat2)

    @pl.when(phase == 1)
    def _conv2():
        # Fused BN1 normalize + leaky applied as h1 is re-read (no extra pass).
        a1 = _leaky(h1_scr[n].astype(jnp.float32) * aff1[0] + aff1[1])  # (Cmid, HW)
        acc = jnp.zeros((Cout, HW), jnp.float32)
        t = 0
        for dy in (-1, 0, 1):
            for dx in (-1, 0, 1):
                s = dy * W + dx
                if s == 0:
                    tap = a1
                else:
                    # pltpu.roll(a, k) == jnp.roll(a, k); we need jnp.roll(a1, -s)
                    # and pltpu.roll wants a non-negative shift -> (-s) % HW.
                    tap = pltpu.roll(a1, (-s) % HW, 1) * mask_ref[t]
                # Per-tap accumulated matmul: only one tap live at a time
                # (no (9*Cmid, HW) concat); MRB accumulation on v7x.
                acc = acc + jnp.dot(w2_ref[t], tap.astype(mm_dtype),
                                    preferred_element_type=jnp.float32)
                t += 1
        stat2[0] += jnp.sum(acc, axis=1, keepdims=True)
        stat2[1] += jnp.sum(acc * acc, axis=1, keepdims=True)
        h2_scr[n] = acc

    # -------------- phase 2 : fused BN2 + leaky + residual add ------------------
    @pl.when((phase == 2) & (n == 0))
    def _finalize_bn2():
        mean = stat2[0] * inv_count
        var = jnp.maximum(stat2[1] * inv_count - mean * mean, 0.0)
        scale = g2_ref[...] * lax.rsqrt(var + EPS)
        aff2[0] = scale
        aff2[1] = be2_ref[...] - mean * scale

    @pl.when(phase == 2)
    def _epilogue():
        h2 = h2_scr[n] * aff2[0] + aff2[1]
        o_ref[0] = (_leaky(h2) + x_ref[0].astype(jnp.float32)).astype(o_ref.dtype)


def residual_block_pallas(x_nchw, params, *, matmul_dtype=jnp.bfloat16):
    """x_nchw: (N, Cin, H, W) float32 (PyTorch layout, consumed without transposes).

    params (kernel layout): w1 (Cmid, Cin), w2 (9, Cout, Cmid) tap-major (ky,kx),
    g1/be1 (Cmid, 1), g2/be2 (Cout, 1).  Conv biases intentionally absent
    (cancelled exactly by BN's batch-mean subtraction).
    """
    w1, w2, g1, be1, g2, be2 = params
    N, Cin, H, W = x_nchw.shape
    Cmid = w1.shape[0]
    Cout = w2.shape[1]
    if Cout != Cin:
        raise ValueError("residual add requires out_channels[1] == in_channel")
    HW = H * W
    # TODO(synk): pad HW to a multiple of 128 (adjust BN divisor, zero the pad)
    # for feature maps like 13x13 / 26x26 so every row stays lane-dense.
    x = x_nchw.reshape(N, Cin, HW)           # contiguous reshape, no data copy

    # Precomputed 0/1 validity mask for the 9 shifted taps (hoisted out of the
    # kernel so no iota/broadcast is re-emitted per image).
    px = jnp.arange(HW, dtype=jnp.int32) % W
    py = jnp.arange(HW, dtype=jnp.int32) // W
    masks = []
    for dy in (-1, 0, 1):
        for dx in (-1, 0, 1):
            valid = (px + dx >= 0) & (px + dx < W) & (py + dy >= 0) & (py + dy < H)
            masks.append(valid)
    tap_mask = jnp.stack(masks).astype(jnp.float32).reshape(9, 1, HW)

    # Generation-aware VMEM budget (~40 MiB on v7x, ~80 MiB on v5e/v6e).
    try:
        vmem_cap = int(pltpu.get_tpu_info().vmem_capacity_bytes)
    except Exception:
        vmem_cap = 64 * 1024 * 1024
    vmem_limit = min((vmem_cap * 5) // 8, 96 * 1024 * 1024)

    kernel = functools.partial(resblock_kernel, W=W, mm_dtype=matmul_dtype)

    grid_spec = pltpu.PrefetchScalarGridSpec(
        num_scalar_prefetch=0,
        grid=(3, N),                                   # (phase, image)
        in_specs=[
            # x is needed in phases 0 (conv1) and 2 (residual); park it on
            # block 0 during phase 1 to avoid redundant DMAs.
            pl.BlockSpec((1, Cin, HW), lambda p, n: (jnp.where(p == 1, 0, n), 0, 0)),
            pl.BlockSpec((Cmid, Cin), lambda p, n: (0, 0)),
            pl.BlockSpec((9, Cout, Cmid), lambda p, n: (0, 0, 0)),
            pl.BlockSpec((9, 1, HW), lambda p, n: (0, 0, 0)),
            pl.BlockSpec((Cmid, 1), lambda p, n: (0, 0)),
            pl.BlockSpec((Cmid, 1), lambda p, n: (0, 0)),
            pl.BlockSpec((Cout, 1), lambda p, n: (0, 0)),
            pl.BlockSpec((Cout, 1), lambda p, n: (0, 0)),
        ],
        # Output blocks are only produced in phase 2; keep the index parked on
        # block 0 before that so each image block is written back exactly once.
        out_specs=pl.BlockSpec((1, Cout, HW),
                               lambda p, n: (jnp.where(p == 2, n, 0), 0, 0)),
        scratch_shapes=[
            pltpu.VMEM((N, Cmid, HW), matmul_dtype),   # h1 staging (bf16 on fast path)
            pltpu.VMEM((N, Cout, HW), jnp.float32),    # h2 staging
            pltpu.VMEM((2, Cmid, 1), jnp.float32),     # BN1 sum / sumsq
            pltpu.VMEM((2, Cmid, 1), jnp.float32),     # BN1 scale / shift
            pltpu.VMEM((2, Cout, 1), jnp.float32),     # BN2 sum / sumsq
            pltpu.VMEM((2, Cout, 1), jnp.float32),     # BN2 scale / shift
        ],
    )
    out = pl.pallas_call(
        kernel,
        out_shape=jax.ShapeDtypeStruct((N, Cout, HW), x_nchw.dtype),
        grid_spec=grid_spec,
        compiler_params=pltpu.CompilerParams(
            # Both axes carry cross-iteration state (phase ordering, BN stats).
            # TODO(synk): add a "parallel" channel-block axis for v7x megacore.
            dimension_semantics=("arbitrary", "arbitrary"),
            vmem_limit_bytes=vmem_limit),
    )(x, w1.astype(matmul_dtype), w2.astype(matmul_dtype), tap_mask,
      g1, be1, g2, be2)
    return out.reshape(N, Cout, H, W)


# ------------------------------ pure-JAX reference ------------------------------
def residual_block_ref(x, torch_params):
    """NCHW reference matching the PyTorch module (training-mode BN, with biases)."""
    w1t, b1, g1, be1, w2t, b2, g2, be2 = torch_params

    def bn(h, g, b):
        mean = jnp.mean(h, axis=(0, 2, 3), keepdims=True)
        var = jnp.mean((h - mean) ** 2, axis=(0, 2, 3), keepdims=True)
        return (h - mean) * lax.rsqrt(var + EPS) * g[None, :, None, None] \
            + b[None, :, None, None]

    dn = lax.conv_dimension_numbers(x.shape, w1t.shape, ('NCHW', 'OIHW', 'NCHW'))
    h = lax.conv_general_dilated(x, w1t, (1, 1), 'VALID', dimension_numbers=dn)
    h = h + b1[None, :, None, None]
    h = _leaky(bn(h, g1, be1))
    dn2 = lax.conv_dimension_numbers(h.shape, w2t.shape, ('NCHW', 'OIHW', 'NCHW'))
    h = lax.conv_general_dilated(h, w2t, (1, 1), ((1, 1), (1, 1)),
                                 dimension_numbers=dn2)
    h = h + b2[None, :, None, None]
    h = _leaky(bn(h, g2, be2))
    return h + x


if __name__ == "__main__":
    # Darknet residual: out_channels = [in_channel // 2, in_channel]
    N, Cin, H, W = 2, 16, 16, 16
    Cmid, Cout = Cin // 2, Cin

    key = jax.random.PRNGKey(0)
    k = jax.random.split(key, 8)
    x = jax.random.normal(k[0], (N, Cin, H, W), jnp.float32)

    # PyTorch-layout parameters (deterministic synthetic init)
    w1_t = jax.random.normal(k[1], (Cmid, Cin, 1, 1), jnp.float32) * 0.2   # OIHW
    b1 = jax.random.normal(k[2], (Cmid,), jnp.float32) * 0.1
    g1 = 1.0 + 0.1 * jax.random.normal(k[3], (Cmid,), jnp.float32)
    be1 = 0.1 * jax.random.normal(k[4], (Cmid,), jnp.float32)
    w2_t = jax.random.normal(k[5], (Cout, Cmid, 3, 3), jnp.float32) * 0.2  # OIHW
    b2 = jax.random.normal(k[6], (Cout,), jnp.float32) * 0.1
    g2 = 1.0 + 0.1 * jax.random.normal(k[7], (Cout,), jnp.float32)
    be2 = jnp.zeros((Cout,), jnp.float32)

    # Kernel-layout parameters (channels-major):
    #   conv1: (Cmid, Cin); conv2: (9, Cout, Cmid) tap-major (ky, kx);
    #   BN vectors as (C, 1).  Conv biases omitted (cancelled by BN mean).
    w1 = w1_t[:, :, 0, 0]
    w2 = jnp.transpose(w2_t, (2, 3, 0, 1)).reshape(9, Cout, Cmid)
    params = (w1, w2, g1.reshape(Cmid, 1), be1.reshape(Cmid, 1),
              g2.reshape(Cout, 1), be2.reshape(Cout, 1))

    ref = residual_block_ref(x, (w1_t, b1, g1, be1, w2_t, b2, g2, be2))

    # f32 matmul path: faithful to the module semantics (tight tolerance).
    out_f32 = jax.block_until_ready(
        residual_block_pallas(x, params, matmul_dtype=jnp.float32))
    assert out_f32.shape == (N, Cout, H, W)
    assert jnp.allclose(out_f32, ref, rtol=1e-3, atol=1e-3), (
        float(jnp.max(jnp.abs(out_f32 - ref))))

    # bf16 MXU operands + bf16 h1 staging (throughput mode); BN math stays f32.
    out_bf16 = jax.block_until_ready(
        residual_block_pallas(x, params, matmul_dtype=jnp.bfloat16))
    assert jnp.allclose(out_bf16, ref, rtol=5e-2, atol=5e-2), (
        float(jnp.max(jnp.abs(out_bf16 - ref))))

    print("KERNEL_OK")
</pallas_src>

<mosaic_0001>
module attributes {stable_mosaic.version = 11 : i64} {
  func.func @resblock_kernel(%arg0: i32, %arg1: i32, %arg2: memref<1x16x256xf32, #tpu.memory_space<vmem>>, %arg3: memref<8x16xf32, #tpu.memory_space<vmem>>, %arg4: memref<9x16x8xf32, #tpu.memory_space<vmem>>, %arg5: memref<9x1x256xf32, #tpu.memory_space<vmem>>, %arg6: memref<8x1xf32, #tpu.memory_space<vmem>>, %arg7: memref<8x1xf32, #tpu.memory_space<vmem>>, %arg8: memref<16x1xf32, #tpu.memory_space<vmem>>, %arg9: memref<16x1xf32, #tpu.memory_space<vmem>>, %arg10: memref<1x16x256xf32, #tpu.memory_space<vmem>>, %arg11: memref<2x8x256xf32, #tpu.memory_space<vmem>>, %arg12: memref<2x16x256xf32, #tpu.memory_space<vmem>>, %arg13: memref<2x8x1xf32, #tpu.memory_space<vmem>>, %arg14: memref<2x8x1xf32, #tpu.memory_space<vmem>>, %arg15: memref<2x16x1xf32, #tpu.memory_space<vmem>>, %arg16: memref<2x16x1xf32, #tpu.memory_space<vmem>>) attributes {dimension_semantics = [#tpu.dimension_semantics<arbitrary>, #tpu.dimension_semantics<arbitrary>], iteration_bounds = array<i64: 3, 2>, scalar_prefetch = 0 : i64, scratch_operands = 6 : i64, tpu.core_type = #tpu.core_type<tc>, window_params = [{transform_indices = @transform_0, window_bounds = array<i64: 1, 16, 256>}, {pipeline_mode = #tpu.pipeline_mode<synchronous>, transform_indices = @transform_1, window_bounds = array<i64: 8, 16>}, {pipeline_mode = #tpu.pipeline_mode<synchronous>, transform_indices = @transform_2, window_bounds = array<i64: 9, 16, 8>}, {pipeline_mode = #tpu.pipeline_mode<synchronous>, transform_indices = @transform_3, window_bounds = array<i64: 9, 1, 256>}, {pipeline_mode = #tpu.pipeline_mode<synchronous>, transform_indices = @transform_4, window_bounds = array<i64: 8, 1>}, {pipeline_mode = #tpu.pipeline_mode<synchronous>, transform_indices = @transform_5, window_bounds = array<i64: 8, 1>}, {pipeline_mode = #tpu.pipeline_mode<synchronous>, transform_indices = @transform_6, window_bounds = array<i64: 16, 1>}, {pipeline_mode = #tpu.pipeline_mode<synchronous>, transform_indices = @transform_7, window_bounds = array<i64: 16, 1>}, {transform_indices = @transform_8, window_bounds = array<i64: 1, 16, 256>}]} {
    %c0_i32 = arith.constant 0 : i32
    %0 = arith.cmpi eq, %arg0, %c0_i32 : i32
    %c0_i32_0 = arith.constant 0 : i32
    %1 = arith.cmpi eq, %arg1, %c0_i32_0 : i32
    %2 = arith.andi %0, %1 : i1
    %3 = arith.extui %2 : i1 to i32
    %c0_i32_1 = arith.constant 0 : i32
    %4 = arith.cmpi ne, %3, %c0_i32_1 : i32
    scf.if %4 {
      %cst = arith.constant 0.000000e+00 : f32
      %24 = vector.broadcast %cst : f32 to vector<2x8x1xf32>
      %c0 = arith.constant 0 : index
      %c0_12 = arith.constant 0 : index
      %c0_13 = arith.constant 0 : index
      %25 = vector.load %arg13[%c0, %c0_12, %c0_13] : memref<2x8x1xf32, #tpu.memory_space<vmem>>, vector<2x8x1xf32>
      tpu.vector_store %arg13[%c0, %c0_12, %c0_13], %24 {strides = array<i32>} : memref<2x8x1xf32, #tpu.memory_space<vmem>>, vector<2x8x1xf32>,
    } else {
    }
    %c0_i32_2 = arith.constant 0 : i32
    %5 = arith.cmpi eq, %arg0, %c0_i32_2 : i32
    %6 = arith.extui %5 : i1 to i32
    %c0_i32_3 = arith.constant 0 : i32
    %7 = arith.cmpi ne, %6, %c0_i32_3 : i32
    scf.if %7 {
      %c0 = arith.constant 0 : index
      %c0_12 = arith.constant 0 : index
      %c0_13 = arith.constant 0 : index
      %24 = vector.load %arg2[%c0, %c0_12, %c0_13] : memref<1x16x256xf32, #tpu.memory_space<vmem>>, vector<1x16x256xf32>
      %25 = vector.shape_cast %24 : vector<1x16x256xf32> to vector<16x256xf32>
      %c0_14 = arith.constant 0 : index
      %c0_15 = arith.constant 0 : index
      %26 = vector.load %arg3[%c0_14, %c0_15] : memref<8x16xf32, #tpu.memory_space<vmem>>, vector<8x16xf32>
      %cst = arith.constant dense<0.000000e+00> : vector<8x256xf32>
      %27 = tpu.matmul %26, %25, %cst {dimension_numbers = #tpu.dot_dimension_numbers<[1], [0], [0], [1], [0, 0, 1, 1], [], []>} : vector<8x16xf32>, vector<16x256xf32>, vector<8x256xf32> -> vector<8x256xf32>
      %c0_16 = arith.constant 0 : index
      %c0_17 = arith.constant 0 : index
      %c0_18 = arith.constant 0 : index
      %28 = vector.load %arg13[%c0_16, %c0_17, %c0_18] : memref<2x8x1xf32, #tpu.memory_space<vmem>>, vector<1x8x1xf32>
      %29 = vector.shape_cast %28 : vector<1x8x1xf32> to vector<8x1xf32>
      %cst_19 = arith.constant dense<0.000000e+00> : vector<8xf32>
      %30 = vector.multi_reduction <add>, %27, %cst_19 [1] : vector<8x256xf32> to vector<8xf32>
      %31 = vector.shape_cast %30 : vector<8xf32> to vector<8x1xf32>
      %32 = arith.addf %29, %31 : vector<8x1xf32>
      %c0_20 = arith.constant 0 : index
      %c0_21 = arith.constant 0 : index
      %c0_22 = arith.constant 0 : index
      %33 = vector.load %arg13[%c0_20, %c0_21, %c0_22] : memref<2x8x1xf32, #tpu.memory_space<vmem>>, vector<1x8x1xf32>
      %34 = vector.shape_cast %33 : vector<1x8x1xf32> to vector<8x1xf32>
      %35 = vector.shape_cast %32 : vector<8x1xf32> to vector<1x8x1xf32>
      tpu.vector_store %arg13[%c0_20, %c0_21, %c0_22], %35 {strides = array<i32>} : memref<2x8x1xf32, #tpu.memory_space<vmem>>, vector<1x8x1xf32>,
      %c1 = arith.constant 1 : index
      %c0_23 = arith.constant 0 : index
      %c0_24 = arith.constant 0 : index
      %36 = vector.load %arg13[%c1, %c0_23, %c0_24] : memref<2x8x1xf32, #tpu.memory_space<vmem>>, vector<1x8x1xf32>
      %37 = vector.shape_cast %36 : vector<1x8x1xf32> to vector<8x1xf32>
      %38 = arith.mulf %27, %27 : vector<8x256xf32>
      %cst_25 = arith.constant dense<0.000000e+00> : vector<8xf32>
      %39 = vector.multi_reduction <add>, %38, %cst_25 [1] : vector<8x256xf32> to vector<8xf32>
      %40 = vector.shape_cast %39 : vector<8xf32> to vector<8x1xf32>
      %41 = arith.addf %37, %40 : vector<8x1xf32>
      %c1_26 = arith.constant 1 : index
      %c0_27 = arith.constant 0 : index
      %c0_28 = arith.constant 0 : index
      %42 = vector.load %arg13[%c1_26, %c0_27, %c0_28] : memref<2x8x1xf32, #tpu.memory_space<vmem>>, vector<1x8x1xf32>
      %43 = vector.shape_cast %42 : vector<1x8x1xf32> to vector<8x1xf32>
      %44 = vector.shape_cast %41 : vector<8x1xf32> to vector<1x8x1xf32>
      tpu.vector_store %arg13[%c1_26, %c0_27, %c0_28], %44 {strides = array<i32>} : memref<2x8x1xf32, #tpu.memory_space<vmem>>, vector<1x8x1xf32>,
      %45 = arith.index_cast %arg1 : i32 to index
      %c0_29 = arith.constant 0 : index
      %c0_30 = arith.constant 0 : index
      %46 = vector.load %arg11[%45, %c0_29, %c0_30] : memref<2x8x256xf32, #tpu.memory_space<vmem>>, vector<1x8x256xf32>
      %47 = vector.shape_cast %46 : vector<1x8x256xf32> to vector<8x256xf32>
      %48 = vector.shape_cast %27 : vector<8x256xf32> to vector<1x8x256xf32>
      tpu.vector_store %arg11[%45, %c0_29, %c0_30], %48 {strides = array<i32>} : memref<2x8x256xf32, #tpu.memory_space<vmem>>, vector<1x8x256xf32>,
    } else {
    }
    %c1_i32 = arith.constant 1 : i32
    %8 = arith.cmpi eq, %arg0, %c1_i32 : i32
    %c0_i32_4 = arith.constant 0 : i32
    %9 = arith.cmpi eq, %arg1, %c0_i32_4 : i32
    %10 = arith.andi %8, %9 : i1
    %11 = arith.extui %10 : i1 to i32
    %c0_i32_5 = arith.constant 0 : i32
    %12 = arith.cmpi ne, %11, %c0_i32_5 : i32
    scf.if %12 {
      %c0 = arith.constant 0 : index
      %c0_12 = arith.constant 0 : index
      %c0_13 = arith.constant 0 : index
      %24 = vector.load %arg13[%c0, %c0_12, %c0_13] : memref<2x8x1xf32, #tpu.memory_space<vmem>>, vector<1x8x1xf32>
      %25 = vector.shape_cast %24 : vector<1x8x1xf32> to vector<8x1xf32>
      %cst = arith.constant 0.001953125 : f32
      %26 = vector.broadcast %cst : f32 to vector<8x1xf32>
      %27 = arith.mulf %25, %26 : vector<8x1xf32>
      %c1 = arith.constant 1 : index
      %c0_14 = arith.constant 0 : index
      %c0_15 = arith.constant 0 : index
      %28 = vector.load %arg13[%c1, %c0_14, %c0_15] : memref<2x8x1xf32, #tpu.memory_space<vmem>>, vector<1x8x1xf32>
      %29 = vector.shape_cast %28 : vector<1x8x1xf32> to vector<8x1xf32>
      %cst_16 = arith.constant 0.001953125 : f32
      %30 = vector.broadcast %cst_16 : f32 to vector<8x1xf32>
      %31 = arith.mulf %29, %30 : vector<8x1xf32>
      %32 = arith.mulf %27, %27 : vector<8x1xf32>
      %33 = arith.subf %31, %32 : vector<8x1xf32>
      %cst_17 = arith.constant 0.000000e+00 : f32
      %34 = vector.broadcast %cst_17 : f32 to vector<8x1xf32>
      %35 = arith.maximumf %33, %34 : vector<8x1xf32>
      %c0_18 = arith.constant 0 : index
      %c0_19 = arith.constant 0 : index
      %36 = vector.load %arg6[%c0_18, %c0_19] : memref<8x1xf32, #tpu.memory_space<vmem>>, vector<8x1xf32>
      %cst_20 = arith.constant 9.99999974E-6 : f32
      %37 = vector.broadcast %cst_20 : f32 to vector<8x1xf32>
      %38 = arith.addf %35, %37 : vector<8x1xf32>
      %39 = math.rsqrt %38 : vector<8x1xf32>
      %40 = arith.mulf %36, %39 : vector<8x1xf32>
      %c0_21 = arith.constant 0 : index
      %c0_22 = arith.constant 0 : index
      %c0_23 = arith.constant 0 : index
      %41 = vector.load %arg14[%c0_21, %c0_22, %c0_23] : memref<2x8x1xf32, #tpu.memory_space<vmem>>, vector<1x8x1xf32>
      %42 = vector.shape_cast %41 : vector<1x8x1xf32> to vector<8x1xf32>
      %43 = vector.shape_cast %40 : vector<8x1xf32> to vector<1x8x1xf32>
      tpu.vector_store %arg14[%c0_21, %c0_22, %c0_23], %43 {strides = array<i32>} : memref<2x8x1xf32, #tpu.memory_space<vmem>>, vector<1x8x1xf32>,
      %c0_24 = arith.constant 0 : index
      %c0_25 = arith.constant 0 : index
      %44 = vector.load %arg7[%c0_24, %c0_25] : memref<8x1xf32, #tpu.memory_space<vmem>>, vector<8x1xf32>
      %45 = arith.mulf %27, %40 : vector<8x1xf32>
      %46 = arith.subf %44, %45 : vector<8x1xf32>
      %c1_26 = arith.constant 1 : index
      %c0_27 = arith.constant 0 : index
      %c0_28 = arith.constant 0 : index
      %47 = vector.load %arg14[%c1_26, %c0_27, %c0_28] : memref<2x8x1xf32, #tpu.memory_space<vmem>>, vector<1x8x1xf32>
      %48 = vector.shape_cast %47 : vector<1x8x1xf32> to vector<8x1xf32>
      %49 = vector.shape_cast %46 : vector<8x1xf32> to vector<1x8x1xf32>
      tpu.vector_store %arg14[%c1_26, %c0_27, %c0_28], %49 {strides = array<i32>} : memref<2x8x1xf32, #tpu.memory_space<vmem>>, vector<1x8x1xf32>,
      %cst_29 = arith.constant 0.000000e+00 : f32
      %50 = vector.broadcast %cst_29 : f32 to vector<2x16x1xf32>
      %c0_30 = arith.constant 0 : index
      %c0_31 = arith.constant 0 : index
      %c0_32 = arith.constant 0 : index
      %51 = vector.load %arg15[%c0_30, %c0_31, %c0_32] : memref<2x16x1xf32, #tpu.memory_space<vmem>>, vector<2x16x1xf32>
      tpu.vector_store %arg15[%c0_30, %c0_31, %c0_32], %50 {strides = array<i32>} : memref<2x16x1xf32, #tpu.memory_space<vmem>>, vector<2x16x1xf32>,
    } else {
    }
    %c1_i32_6 = arith.constant 1 : i32
    %13 = arith.cmpi eq, %arg0, %c1_i32_6 : i32
    %14 = arith.extui %13 : i1 to i32
    %c0_i32_7 = arith.constant 0 : i32
    %15 = arith.cmpi ne, %14, %c0_i32_7 : i32
    scf.if %15 {
      %24 = arith.index_cast %arg1 : i32 to index
      %c0 = arith.constant 0 : index
      %c0_12 = arith.constant 0 : index
      %25 = vector.load %arg11[%24, %c0, %c0_12] : memref<2x8x256xf32, #tpu.memory_space<vmem>>, vector<1x8x256xf32>
      %26 = vector.shape_cast %25 : vector<1x8x256xf32> to vector<8x256xf32>
      %c0_13 = arith.constant 0 : index
      %c0_14 = arith.constant 0 : index
      %c0_15 = arith.constant 0 : index
      %27 = vector.load %arg14[%c0_13, %c0_14, %c0_15] : memref<2x8x1xf32, #tpu.memory_space<vmem>>, vector<1x8x1xf32>
      %28 = vector.shape_cast %27 : vector<1x8x1xf32> to vector<8x1xf32>
      %29 = vector.broadcast %28 : vector<8x1xf32> to vector<8x256xf32>
      %30 = arith.mulf %26, %29 : vector<8x256xf32>
      %c1 = arith.constant 1 : index
      %c0_16 = arith.constant 0 : index
      %c0_17 = arith.constant 0 : index
      %31 = vector.load %arg14[%c1, %c0_16, %c0_17] : memref<2x8x1xf32, #tpu.memory_space<vmem>>, vector<1x8x1xf32>
      %32 = vector.shape_cast %31 : vector<1x8x1xf32> to vector<8x1xf32>
      %33 = vector.broadcast %32 : vector<8x1xf32> to vector<8x256xf32>
      %34 = arith.addf %30, %33 : vector<8x256xf32>
      %cst = arith.constant 1.000000e-01 : f32
      %35 = vector.broadcast %cst : f32 to vector<8x256xf32>
      %36 = arith.mulf %35, %34 : vector<8x256xf32>
      %37 = arith.maximumf %34, %36 : vector<8x256xf32>
      %cst_18 = arith.constant 0.000000e+00 : f32
      %38 = vector.broadcast %cst_18 : f32 to vector<16x256xf32>
      %c17_i32 = arith.constant 17 : i32
      %39 = tpu.dynamic_rotate %37 by %c17_i32 dim 1 : vector<8x256xf32>, i32 -> vector<8x256xf32>
      %c0_19 = arith.constant 0 : index
      %c0_20 = arith.constant 0 : index
      %c0_21 = arith.constant 0 : index
      %40 = vector.load %arg5[%c0_19, %c0_20, %c0_21] : memref<9x1x256xf32, #tpu.memory_space<vmem>>, vector<1x1x256xf32>
      %41 = vector.shape_cast %40 : vector<1x1x256xf32> to vector<1x256xf32>
      %42 = vector.broadcast %41 : vector<1x256xf32> to vector<8x256xf32>
      %43 = arith.mulf %39, %42 : vector<8x256xf32>
      %c0_22 = arith.constant 0 : index
      %c0_23 = arith.constant 0 : index
      %c0_24 = arith.constant 0 : index
      %44 = vector.load %arg4[%c0_22, %c0_23, %c0_24] : memref<9x16x8xf32, #tpu.memory_space<vmem>>, vector<1x16x8xf32>
      %45 = vector.shape_cast %44 : vector<1x16x8xf32> to vector<16x8xf32>
      %cst_25 = arith.constant dense<0.000000e+00> : vector<16x256xf32>
      %46 = tpu.matmul %45, %43, %cst_25 {dimension_numbers = #tpu.dot_dimension_numbers<[1], [0], [0], [1], [0, 0, 1, 1], [], []>} : vector<16x8xf32>, vector<8x256xf32>, vector<16x256xf32> -> vector<16x256xf32>
      %47 = arith.addf %38, %46 : vector<16x256xf32>
      %c16_i32 = arith.constant 16 : i32
      %48 = tpu.dynamic_rotate %37 by %c16_i32 dim 1 : vector<8x256xf32>, i32 -> vector<8x256xf32>
      %c1_26 = arith.constant 1 : index
      %c0_27 = arith.constant 0 : index
      %c0_28 = arith.constant 0 : index
      %49 = vector.load %arg5[%c1_26, %c0_27, %c0_28] : memref<9x1x256xf32, #tpu.memory_space<vmem>>, vector<1x1x256xf32>
      %50 = vector.shape_cast %49 : vector<1x1x256xf32> to vector<1x256xf32>
      %51 = vector.broadcast %50 : vector<1x256xf32> to vector<8x256xf32>
      %52 = arith.mulf %48, %51 : vector<8x256xf32>
      %c1_29 = arith.constant 1 : index
      %c0_30 = arith.constant 0 : index
      %c0_31 = arith.constant 0 : index
      %53 = vector.load %arg4[%c1_29, %c0_30, %c0_31] : memref<9x16x8xf32, #tpu.memory_space<vmem>>, vector<1x16x8xf32>
      %54 = vector.shape_cast %53 : vector<1x16x8xf32> to vector<16x8xf32>
      %cst_32 = arith.constant dense<0.000000e+00> : vector<16x256xf32>
      %55 = tpu.matmul %54, %52, %cst_32 {dimension_numbers = #tpu.dot_dimension_numbers<[1], [0], [0], [1], [0, 0, 1, 1], [], []>} : vector<16x8xf32>, vector<8x256xf32>, vector<16x256xf32> -> vector<16x256xf32>
      %56 = arith.addf %47, %55 : vector<16x256xf32>
      %c15_i32 = arith.constant 15 : i32
      %57 = tpu.dynamic_rotate %37 by %c15_i32 dim 1 : vector<8x256xf32>, i32 -> vector<8x256xf32>
      %c2 = arith.constant 2 : index
      %c0_33 = arith.constant 0 : index
      %c0_34 = arith.constant 0 : index
      %58 = vector.load %arg5[%c2, %c0_33, %c0_34] : memref<9x1x256xf32, #tpu.memory_space<vmem>>, vector<1x1x256xf32>
      %59 = vector.shape_cast %58 : vector<1x1x256xf32> to vector<1x256xf32>
      %60 = vector.broadcast %59 : vector<1x256xf32> to vector<8x256xf32>
      %61 = arith.mulf %57, %60 : vector<8x256xf32>
      %c2_35 = arith.constant 2 : index
      %c0_36 = arith.constant 0 : index
      %c0_37 = arith.constant 0 : index
      %62 = vector.load %arg4[%c2_35, %c0_36, %c0_37] : memref<9x16x8xf32, #tpu.memory_space<vmem>>, vector<1x16x8xf32>
      %63 = vector.shape_cast %62 : vector<1x16x8xf32> to vector<16x8xf32>
      %cst_38 = arith.constant dense<0.000000e+00> : vector<16x256xf32>
      %64 = tpu.matmul %63, %61, %cst_38 {dimension_numbers = #tpu.dot_dimension_numbers<[1], [0], [0], [1], [0, 0, 1, 1], [], []>} : vector<16x8xf32>, vector<8x256xf32>, vector<16x256xf32> -> vector<16x256xf32>
      %65 = arith.addf %56, %64 : vector<16x256xf32>
      %c1_i32_39 = arith.constant 1 : i32
      %66 = tpu.dynamic_rotate %37 by %c1_i32_39 dim 1 : vector<8x256xf32>, i32 -> vector<8x256xf32>
      %c3 = arith.constant 3 : index
      %c0_40 = arith.constant 0 : index
      %c0_41 = arith.constant 0 : index
      %67 = vector.load %arg5[%c3, %c0_40, %c0_41] : memref<9x1x256xf32, #tpu.memory_space<vmem>>, vector<1x1x256xf32>
      %68 = vector.shape_cast %67 : vector<1x1x256xf32> to vector<1x256xf32>
      %69 = vector.broadcast %68 : vector<1x256xf32> to vector<8x256xf32>
      %70 = arith.mulf %66, %69 : vector<8x256xf32>
      %c3_42 = arith.constant 3 : index
      %c0_43 = arith.constant 0 : index
      %c0_44 = arith.constant 0 : index
      %71 = vector.load %arg4[%c3_42, %c0_43, %c0_44] : memref<9x16x8xf32, #tpu.memory_space<vmem>>, vector<1x16x8xf32>
      %72 = vector.shape_cast %71 : vector<1x16x8xf32> to vector<16x8xf32>
      %cst_45 = arith.constant dense<0.000000e+00> : vector<16x256xf32>
      %73 = tpu.matmul %72, %70, %cst_45 {dimension_numbers = #tpu.dot_dimension_numbers<[1], [0], [0], [1], [0, 0, 1, 1], [], []>} : vector<16x8xf32>, vector<8x256xf32>, vector<16x256xf32> -> vector<16x256xf32>
      %74 = arith.addf %65, %73 : vector<16x256xf32>
      %c4 = arith.constant 4 : index
      %c0_46 = arith.constant 0 : index
      %c0_47 = arith.constant 0 : index
      %75 = vector.load %arg4[%c4, %c0_46, %c0_47] : memref<9x16x8xf32, #tpu.memory_space<vmem>>, vector<1x16x8xf32>
      %76 = vector.shape_cast %75 : vector<1x16x8xf32> to vector<16x8xf32>
      %cst_48 = arith.constant dense<0.000000e+00> : vector<16x256xf32>
      %77 = tpu.matmul %76, %37, %cst_48 {dimension_numbers = #tpu.dot_dimension_numbers<[1], [0], [0], [1], [0, 0, 1, 1], [], []>} : vector<16x8xf32>, vector<8x256xf32>, vector<16x256xf32> -> vector<16x256xf32>
      %78 = arith.addf %74, %77 : vector<16x256xf32>
      %c255_i32 = arith.constant 255 : i32
      %79 = tpu.dynamic_rotate %37 by %c255_i32 dim 1 : vector<8x256xf32>, i32 -> vector<8x256xf32>
      %c5 = arith.constant 5 : index
      %c0_49 = arith.constant 0 : index
      %c0_50 = arith.constant 0 : index
      %80 = vector.load %arg5[%c5, %c0_49, %c0_50] : memref<9x1x256xf32, #tpu.memory_space<vmem>>, vector<1x1x256xf32>
      %81 = vector.shape_cast %80 : vector<1x1x256xf32> to vector<1x256xf32>
      %82 = vector.broadcast %81 : vector<1x256xf32> to vector<8x256xf32>
      %83 = arith.mulf %79, %82 : vector<8x256xf32>
      %c5_51 = arith.constant 5 : index
      %c0_52 = arith.constant 0 : index
      %c0_53 = arith.constant 0 : index
      %84 = vector.load %arg4[%c5_51, %c0_52, %c0_53] : memref<9x16x8xf32, #tpu.memory_space<vmem>>, vector<1x16x8xf32>
      %85 = vector.shape_cast %84 : vector<1x16x8xf32> to vector<16x8xf32>
      %cst_54 = arith.constant dense<0.000000e+00> : vector<16x256xf32>
      %86 = tpu.matmul %85, %83, %cst_54 {dimension_numbers = #tpu.dot_dimension_numbers<[1], [0], [0], [1], [0, 0, 1, 1], [], []>} : vector<16x8xf32>, vector<8x256xf32>, vector<16x256xf32> -> vector<16x256xf32>
      %87 = arith.addf %78, %86 : vector<16x256xf32>
      %c241_i32 = arith.constant 241 : i32
      %88 = tpu.dynamic_rotate %37 by %c241_i32 dim 1 : vector<8x256xf32>, i32 -> vector<8x256xf32>
      %c6 = arith.constant 6 : index
      %c0_55 = arith.constant 0 : index
      %c0_56 = arith.constant 0 : index
      %89 = vector.load %arg5[%c6, %c0_55, %c0_56] : memref<9x1x256xf32, #tpu.memory_space<vmem>>, vector<1x1x256xf32>
      %90 = vector.shape_cast %89 : vector<1x1x256xf32> to vector<1x256xf32>
      %91 = vector.broadcast %90 : vector<1x256xf32> to vector<8x256xf32>
      %92 = arith.mulf %88, %91 : vector<8x256xf32>
      %c6_57 = arith.constant 6 : index
      %c0_58 = arith.constant 0 : index
      %c0_59 = arith.constant 0 : index
      %93 = vector.load %arg4[%c6_57, %c0_58, %c0_59] : memref<9x16x8xf32, #tpu.memory_space<vmem>>, vector<1x16x8xf32>
      %94 = vector.shape_cast %93 : vector<1x16x8xf32> to vector<16x8xf32>
      %cst_60 = arith.constant dense<0.000000e+00> : vector<16x256xf32>
      %95 = tpu.matmul %94, %92, %cst_60 {dimension_numbers = #tpu.dot_dimension_numbers<[1], [0], [0], [1], [0, 0, 1, 1], [], []>} : vector<16x8xf32>, vector<8x256xf32>, vector<16x256xf32> -> vector<16x256xf32>
      %96 = arith.addf %87, %95 : vector<16x256xf32>
      %c240_i32 = arith.constant 240 : i32
      %97 = tpu.dynamic_rotate %37 by %c240_i32 dim 1 : vector<8x256xf32>, i32 -> vector<8x256xf32>
      %c7 = arith.constant 7 : index
      %c0_61 = arith.constant 0 : index
      %c0_62 = arith.constant 0 : index
      %98 = vector.load %arg5[%c7, %c0_61, %c0_62] : memref<9x1x256xf32, #tpu.memory_space<vmem>>, vector<1x1x256xf32>
      %99 = vector.shape_cast %98 : vector<1x1x256xf32> to vector<1x256xf32>
      %100 = vector.broadcast %99 : vector<1x256xf32> to vector<8x256xf32>
      %101 = arith.mulf %97, %100 : vector<8x256xf32>
      %c7_63 = arith.constant 7 : index
      %c0_64 = arith.constant 0 : index
      %c0_65 = arith.constant 0 : index
      %102 = vector.load %arg4[%c7_63, %c0_64, %c0_65] : memref<9x16x8xf32, #tpu.memory_space<vmem>>, vector<1x16x8xf32>
      %103 = vector.shape_cast %102 : vector<1x16x8xf32> to vector<16x8xf32>
      %cst_66 = arith.constant dense<0.000000e+00> : vector<16x256xf32>
      %104 = tpu.matmul %103, %101, %cst_66 {dimension_numbers = #tpu.dot_dimension_numbers<[1], [0], [0], [1], [0, 0, 1, 1], [], []>} : vector<16x8xf32>, vector<8x256xf32>, vector<16x256xf32> -> vector<16x256xf32>
      %105 = arith.addf %96, %104 : vector<16x256xf32>
      %c239_i32 = arith.constant 239 : i32
      %106 = tpu.dynamic_rotate %37 by %c239_i32 dim 1 : vector<8x256xf32>, i32 -> vector<8x256xf32>
      %c8 = arith.constant 8 : index
      %c0_67 = arith.constant 0 : index
      %c0_68 = arith.constant 0 : index
      %107 = vector.load %arg5[%c8, %c0_67, %c0_68] : memref<9x1x256xf32, #tpu.memory_space<vmem>>, vector<1x1x256xf32>
      %108 = vector.shape_cast %107 : vector<1x1x256xf32> to vector<1x256xf32>
      %109 = vector.broadcast %108 : vector<1x256xf32> to vector<8x256xf32>
      %110 = arith.mulf %106, %109 : vector<8x256xf32>
      %c8_69 = arith.constant 8 : index
      %c0_70 = arith.constant 0 : index
      %c0_71 = arith.constant 0 : index
      %111 = vector.load %arg4[%c8_69, %c0_70, %c0_71] : memref<9x16x8xf32, #tpu.memory_space<vmem>>, vector<1x16x8xf32>
      %112 = vector.shape_cast %111 : vector<1x16x8xf32> to vector<16x8xf32>
      %cst_72 = arith.constant dense<0.000000e+00> : vector<16x256xf32>
      %113 = tpu.matmul %112, %110, %cst_72 {dimension_numbers = #tpu.dot_dimension_numbers<[1], [0], [0], [1], [0, 0, 1, 1], [], []>} : vector<16x8xf32>, vector<8x256xf32>, vector<16x256xf32> -> vector<16x256xf32>
      %114 = arith.addf %105, %113 : vector<16x256xf32>
      %c0_73 = arith.constant 0 : index
      %c0_74 = arith.constant 0 : index
      %c0_75 = arith.constant 0 : index
      %115 = vector.load %arg15[%c0_73, %c0_74, %c0_75] : memref<2x16x1xf32, #tpu.memory_space<vmem>>, vector<1x16x1xf32>
      %116 = vector.shape_cast %115 : vector<1x16x1xf32> to vector<16x1xf32>
      %cst_76 = arith.constant dense<0.000000e+00> : vector<16xf32>
      %117 = vector.multi_reduction <add>, %114, %cst_76 [1] : vector<16x256xf32> to vector<16xf32>
      %118 = vector.shape_cast %117 : vector<16xf32> to vector<16x1xf32>
      %119 = arith.addf %116, %118 : vector<16x1xf32>
      %c0_77 = arith.constant 0 : index
      %c0_78 = arith.constant 0 : index
      %c0_79 = arith.constant 0 : index
      %120 = vector.load %arg15[%c0_77, %c0_78, %c0_79] : memref<2x16x1xf32, #tpu.memory_space<vmem>>, vector<1x16x1xf32>
      %121 = vector.shape_cast %120 : vector<1x16x1xf32> to vector<16x1xf32>
      %122 = vector.shape_cast %119 : vector<16x1xf32> to vector<1x16x1xf32>
      tpu.vector_store %arg15[%c0_77, %c0_78, %c0_79], %122 {strides = array<i32>} : memref<2x16x1xf32, #tpu.memory_space<vmem>>, vector<1x16x1xf32>,
      %c1_80 = arith.constant 1 : index
      %c0_81 = arith.constant 0 : index
      %c0_82 = arith.constant 0 : index
      %123 = vector.load %arg15[%c1_80, %c0_81, %c0_82] : memref<2x16x1xf32, #tpu.memory_space<vmem>>, vector<1x16x1xf32>
      %124 = vector.shape_cast %123 : vector<1x16x1xf32> to vector<16x1xf32>
      %125 = arith.mulf %114, %114 : vector<16x256xf32>
      %cst_83 = arith.constant dense<0.000000e+00> : vector<16xf32>
      %126 = vector.multi_reduction <add>, %125, %cst_83 [1] : vector<16x256xf32> to vector<16xf32>
      %127 = vector.shape_cast %126 : vector<16xf32> to vector<16x1xf32>
      %128 = arith.addf %124, %127 : vector<16x1xf32>
      %c1_84 = arith.constant 1 : index
      %c0_85 = arith.constant 0 : index
      %c0_86 = arith.constant 0 : index
      %129 = vector.load %arg15[%c1_84, %c0_85, %c0_86] : memref<2x16x1xf32, #tpu.memory_space<vmem>>, vector<1x16x1xf32>
      %130 = vector.shape_cast %129 : vector<1x16x1xf32> to vector<16x1xf32>
      %131 = vector.shape_cast %128 : vector<16x1xf32> to vector<1x16x1xf32>
      tpu.vector_store %arg15[%c1_84, %c0_85, %c0_86], %131 {strides = array<i32>} : memref<2x16x1xf32, #tpu.memory_space<vmem>>, vector<1x16x1xf32>,
      %132 = arith.index_cast %arg1 : i32 to index
      %c0_87 = arith.constant 0 : index
      %c0_88 = arith.constant 0 : index
      %133 = vector.load %arg12[%132, %c0_87, %c0_88] : memref<2x16x256xf32, #tpu.memory_space<vmem>>, vector<1x16x256xf32>
      %134 = vector.shape_cast %133 : vector<1x16x256xf32> to vector<16x256xf32>
      %135 = vector.shape_cast %114 : vector<16x256xf32> to vector<1x16x256xf32>
      tpu.vector_store %arg12[%132, %c0_87, %c0_88], %135 {strides = array<i32>} : memref<2x16x256xf32, #tpu.memory_space<vmem>>, vector<1x16x256xf32>,
    } else {
    }
    %c2_i32 = arith.constant 2 : i32
    %16 = arith.cmpi eq, %arg0, %c2_i32 : i32
    %c0_i32_8 = arith.constant 0 : i32
    %17 = arith.cmpi eq, %arg1, %c0_i32_8 : i32
    %18 = arith.andi %16, %17 : i1
    %19 = arith.extui %18 : i1 to i32
    %c0_i32_9 = arith.constant 0 : i32
    %20 = arith.cmpi ne, %19, %c0_i32_9 : i32
    scf.if %20 {
      %c0 = arith.constant 0 : index
      %c0_12 = arith.constant 0 : index
      %c0_13 = arith.constant 0 : index
      %24 = vector.load %arg15[%c0, %c0_12, %c0_13] : memref<2x16x1xf32, #tpu.memory_space<vmem>>, vector<1x16x1xf32>
      %25 = vector.shape_cast %24 : vector<1x16x1xf32> to vector<16x1xf32>
      %cst = arith.constant 0.001953125 : f32
      %26 = vector.broadcast %cst : f32 to vector<16x1xf32>
      %27 = arith.mulf %25, %26 : vector<16x1xf32>
      %c1 = arith.constant 1 : index
      %c0_14 = arith.constant 0 : index
      %c0_15 = arith.constant 0 : index
      %28 = vector.load %arg15[%c1, %c0_14, %c0_15] : memref<2x16x1xf32, #tpu.memory_space<vmem>>, vector<1x16x1xf32>
      %29 = vector.shape_cast %28 : vector<1x16x1xf32> to vector<16x1xf32>
      %cst_16 = arith.constant 0.001953125 : f32
      %30 = vector.broadcast %cst_16 : f32 to vector<16x1xf32>
      %31 = arith.mulf %29, %30 : vector<16x1xf32>
      %32 = arith.mulf %27, %27 : vector<16x1xf32>
      %33 = arith.subf %31, %32 : vector<16x1xf32>
      %cst_17 = arith.constant 0.000000e+00 : f32
      %34 = vector.broadcast %cst_17 : f32 to vector<16x1xf32>
      %35 = arith.maximumf %33, %34 : vector<16x1xf32>
      %c0_18 = arith.constant 0 : index
      %c0_19 = arith.constant 0 : index
      %36 = vector.load %arg8[%c0_18, %c0_19] : memref<16x1xf32, #tpu.memory_space<vmem>>, vector<16x1xf32>
      %cst_20 = arith.constant 9.99999974E-6 : f32
      %37 = vector.broadcast %cst_20 : f32 to vector<16x1xf32>
      %38 = arith.addf %35, %37 : vector<16x1xf32>
      %39 = math.rsqrt %38 : vector<16x1xf32>
      %40 = arith.mulf %36, %39 : vector<16x1xf32>
      %c0_21 = arith.constant 0 : index
      %c0_22 = arith.constant 0 : index
      %c0_23 = arith.constant 0 : index
      %41 = vector.load %arg16[%c0_21, %c0_22, %c0_23] : memref<2x16x1xf32, #tpu.memory_space<vmem>>, vector<1x16x1xf32>
      %42 = vector.shape_cast %41 : vector<1x16x1xf32> to vector<16x1xf32>
      %43 = vector.shape_cast %40 : vector<16x1xf32> to vector<1x16x1xf32>
      tpu.vector_store %arg16[%c0_21, %c0_22, %c0_23], %43 {strides = array<i32>} : memref<2x16x1xf32, #tpu.memory_space<vmem>>, vector<1x16x1xf32>,
      %c0_24 = arith.constant 0 : index
      %c0_25 = arith.constant 0 : index
      %44 = vector.load %arg9[%c0_24, %c0_25] : memref<16x1xf32, #tpu.memory_space<vmem>>, vector<16x1xf32>
      %45 = arith.mulf %27, %40 : vector<16x1xf32>
      %46 = arith.subf %44, %45 : vector<16x1xf32>
      %c1_26 = arith.constant 1 : index
      %c0_27 = arith.constant 0 : index
      %c0_28 = arith.constant 0 : index
      %47 = vector.load %arg16[%c1_26, %c0_27, %c0_28] : memref<2x16x1xf32, #tpu.memory_space<vmem>>, vector<1x16x1xf32>
      %48 = vector.shape_cast %47 : vector<1x16x1xf32> to vector<16x1xf32>
      %49 = vector.shape_cast %46 : vector<16x1xf32> to vector<1x16x1xf32>
      tpu.vector_store %arg16[%c1_26, %c0_27, %c0_28], %49 {strides = array<i32>} : memref<2x16x1xf32, #tpu.memory_space<vmem>>, vector<1x16x1xf32>,
    } else {
    }
    %c2_i32_10 = arith.constant 2 : i32
    %21 = arith.cmpi eq, %arg0, %c2_i32_10 : i32
    %22 = arith.extui %21 : i1 to i32
    %c0_i32_11 = arith.constant 0 : i32
    %23 = arith.cmpi ne, %22, %c0_i32_11 : i32
    scf.if %23 {
      %24 = arith.index_cast %arg1 : i32 to index
      %c0 = arith.constant 0 : index
      %c0_12 = arith.constant 0 : index
      %25 = vector.load %arg12[%24, %c0, %c0_12] : memref<2x16x256xf32, #tpu.memory_space<vmem>>, vector<1x16x256xf32>
      %26 = vector.shape_cast %25 : vector<1x16x256xf32> to vector<16x256xf32>
      %c0_13 = arith.constant 0 : index
      %c0_14 = arith.constant 0 : index
      %c0_15 = arith.constant 0 : index
      %27 = vector.load %arg16[%c0_13, %c0_14, %c0_15] : memref<2x16x1xf32, #tpu.memory_space<vmem>>, vector<1x16x1xf32>
      %28 = vector.shape_cast %27 : vector<1x16x1xf32> to vector<16x1xf32>
      %29 = vector.broadcast %28 : vector<16x1xf32> to vector<16x256xf32>
      %30 = arith.mulf %26, %29 : vector<16x256xf32>
      %c1 = arith.constant 1 : index
      %c0_16 = arith.constant 0 : index
      %c0_17 = arith.constant 0 : index
      %31 = vector.load %arg16[%c1, %c0_16, %c0_17] : memref<2x16x1xf32, #tpu.memory_space<vmem>>, vector<1x16x1xf32>
      %32 = vector.shape_cast %31 : vector<1x16x1xf32> to vector<16x1xf32>
      %33 = vector.broadcast %32 : vector<16x1xf32> to vector<16x256xf32>
      %34 = arith.addf %30, %33 : vector<16x256xf32>
      %cst = arith.constant 1.000000e-01 : f32
      %35 = vector.broadcast %cst : f32 to vector<16x256xf32>
      %36 = arith.mulf %35, %34 : vector<16x256xf32>
      %37 = arith.maximumf %34, %36 : vector<16x256xf32>
      %c0_18 = arith.constant 0 : index
      %c0_19 = arith.constant 0 : index
      %c0_20 = arith.constant 0 : index
      %38 = vector.load %arg2[%c0_18, %c0_19, %c0_20] : memref<1x16x256xf32, #tpu.memory_space<vmem>>, vector<1x16x256xf32>
      %39 = vector.shape_cast %38 : vector<1x16x256xf32> to vector<16x256xf32>
      %40 = arith.addf %37, %39 : vector<16x256xf32>
      %c0_21 = arith.constant 0 : index
      %c0_22 = arith.constant 0 : index
      %c0_23 = arith.constant 0 : index
      %41 = vector.load %arg10[%c0_21, %c0_22, %c0_23] : memref<1x16x256xf32, #tpu.memory_space<vmem>>, vector<1x16x256xf32>
      %42 = vector.shape_cast %41 : vector<1x16x256xf32> to vector<16x256xf32>
      %43 = vector.shape_cast %40 : vector<16x256xf32> to vector<1x16x256xf32>
      tpu.vector_store %arg10[%c0_21, %c0_22, %c0_23], %43 {strides = array<i32>} : memref<1x16x256xf32, #tpu.memory_space<vmem>>, vector<1x16x256xf32>,
    } else {
    }
    return
  }
  func.func @transform_0(%arg0: i32, %arg1: i32) -> (i32, i32, i32) {
    %c1_i32 = arith.constant 1 : i32
    %0 = arith.cmpi eq, %arg0, %c1_i32 : i32
    %c0_i32 = arith.constant 0 : i32
    %1 = arith.select %0, %c0_i32, %arg1 : i32
    %c0_i32_0 = arith.constant 0 : i32
    %c0_i32_1 = arith.constant 0 : i32
    %c0_i32_2 = arith.constant 0 : i32
    return %1, %c0_i32_0, %c0_i32_1 : i32, i32, i32
  }
  func.func @transform_1(%arg0: i32, %arg1: i32) -> (i32, i32) {
    %c0_i32 = arith.constant 0 : i32
    %c0_i32_0 = arith.constant 0 : i32
    %c0_i32_1 = arith.constant 0 : i32
    return %c0_i32, %c0_i32_0 : i32, i32
  }
  func.func @transform_2(%arg0: i32, %arg1: i32) -> (i32, i32, i32) {
    %c0_i32 = arith.constant 0 : i32
    %c0_i32_0 = arith.constant 0 : i32
    %c0_i32_1 = arith.constant 0 : i32
    %c0_i32_2 = arith.constant 0 : i32
    return %c0_i32, %c0_i32_0, %c0_i32_1 : i32, i32, i32
  }
  func.func @transform_3(%arg0: i32, %arg1: i32) -> (i32, i32, i32) {
    %c0_i32 = arith.constant 0 : i32
    %c0_i32_0 = arith.constant 0 : i32
    %c0_i32_1 = arith.constant 0 : i32
    %c0_i32_2 = arith.constant 0 : i32
    return %c0_i32, %c0_i32_0, %c0_i32_1 : i32, i32, i32
  }
  func.func @transform_4(%arg0: i32, %arg1: i32) -> (i32, i32) {
    %c0_i32 = arith.constant 0 : i32
    %c0_i32_0 = arith.constant 0 : i32
    %c0_i32_1 = arith.constant 0 : i32
    return %c0_i32, %c0_i32_0 : i32, i32
  }
  func.func @transform_5(%arg0: i32, %arg1: i32) -> (i32, i32) {
    %c0_i32 = arith.constant 0 : i32
    %c0_i32_0 = arith.constant 0 : i32
    %c0_i32_1 = arith.constant 0 : i32
    return %c0_i32, %c0_i32_0 : i32, i32
  }
  func.func @transform_6(%arg0: i32, %arg1: i32) -> (i32, i32) {
    %c0_i32 = arith.constant 0 : i32
    %c0_i32_0 = arith.constant 0 : i32
    %c0_i32_1 = arith.constant 0 : i32
    return %c0_i32, %c0_i32_0 : i32, i32
  }
  func.func @transform_7(%arg0: i32, %arg1: i32) -> (i32, i32) {
    %c0_i32 = arith.constant 0 : i32
    %c0_i32_0 = arith.constant 0 : i32
    %c0_i32_1 = arith.constant 0 : i32
    return %c0_i32, %c0_i32_0 : i32, i32
  }
  func.func @transform_8(%arg0: i32, %arg1: i32) -> (i32, i32, i32) {
    %c2_i32 = arith.constant 2 : i32
    %0 = arith.cmpi eq, %arg0, %c2_i32 : i32
    %c0_i32 = arith.constant 0 : i32
    %1 = arith.select %0, %arg1, %c0_i32 : i32
    %c0_i32_0 = arith.constant 0 : i32
    %c0_i32_1 = arith.constant 0 : i32
    %c0_i32_2 = arith.constant 0 : i32
    return %1, %c0_i32_0, %c0_i32_1 : i32, i32, i32
  }
}

</mosaic_0001>

<bundles_post_ra>
// kernel: tpu_custom_call.1
= control target key start
LH: loop header
LB: loop body
LE: loop exit
PB: predicated region body
PF: predicated region fallthrough
CT: control target
= control target key end

     0   :  { %s2422_s0 = inlined_call_operand.vmem [shape: f32[2,16,256], index: 0, kind: input, shape index: {}]   ;;  %s2423_s1 = inlined_call_operand.vmem [shape: f32[8,16], index: 1, kind: input, shape index: {}]   ;;  %s2424_s2 = inlined_call_operand.vmem [shape: f32[9,16,8], index: 2, kind: input, shape index: {}]   ;;  %s2425_s3 = inlined_call_operand.vmem [shape: f32[9,1,256], index: 3, kind: input, shape index: {}]   ;;  %s2426_s4 = inlined_call_operand.vmem [shape: f32[8,1], index: 4, kind: input, shape index: {}]   ;;  %s2427_s5 = inlined_call_operand.vmem [shape: f32[8,1], index: 5, kind: input, shape index: {}]   ;;  %s2428_s6 = inlined_call_operand.vmem [shape: f32[16,1], index: 6, kind: input, shape index: {}]   ;;  %s2429_s7 = inlined_call_operand.vmem [shape: f32[16,1], index: 7, kind: input, shape index: {}]   ;;  %s2430_s8 = inlined_call_operand.hbm [shape: f32[2,16,256], index: 8, kind: output, shape index: {}]  }
   0x1   :  { %2432 = sst [smem:[#allocation11_spill]] %s2422_s0 }
   0x2   :  { %13 = vsyncpa [#allocation9], 0 }
   0x3   :  { %15 = vsyncpa [#allocation9 + $0x1], 0  ;;  %s2048_s27 = smov 0   ;;  %s2050_s28 = smov 0  }
   0x4   :  { %s2052_s29 = smov 0   ;;  %s2054_s30 = smov 0  }
   0x5   :  { %s2056_s9 = smov 0   ;;  %s2058_s10 = smov 0  }
   0x6   :  { %s2060_s11 = smov 0   ;;  %s2062_s12 = smov 0  }
   0x7 LB: > { %s1722_s13 = sadd.s32 4294967295, %s1984_s12   ;;  %s30_s14 = sadd.s32 1, %s1976_s10  ;;  %s1984_s12 = sphi %s2062_s12, %s21_s12   ;;  %s1980_s11 = sphi %s2060_s11, %s2443_s11   ;;  %s1976_s10 = sphi %s2058_s10, %s2442_s10   ;;  %s1972_s9 = sphi %s2056_s9, %s2441_s9   ;;  %s1968_s30 = sphi %s2054_s30, %s2440_s30   ;;  %s1964_s29 = sphi %s2052_s29, %s2439_s29   ;;  %s1960_s28 = sphi %s2050_s28, %s2438_s28   ;;  %s1956_s27 = sphi %s2048_s27, %s2437_s27  }
   0x8   : > { %s33_s15 = sadd.s32 1, %s1980_s11  ;;  %p31_p0 = scmp.ge.s32.totalorder %s30_s14, 2 }
   0x9   : > { %p214_p1 = scmp.eq.s32.totalorder %s1980_s11, 2  ;;  %s1723_s16 = sadd.s32 4294967294, %s1984_s12  }
   0xa   : > { %p231_p2 = scmp.ne.s32.totalorder %s1964_s29, %s1960_s28  ;;  %s2445_s14 = smov (%p31_p0, %s30_s14), 0 }
   0xb   : > { %s2447_s15 = smov (!%p31_p0, %s33_s15), %s1980_s11  ;;  %p232_p4 = scmp.eq.s32.totalorder %s1722_s13, 5 }
   0xc   : > { %s215_s17 = scalar_select %p214_p1, %s1976_s10, 0 }
   0xd   : > { %p35_p3 = scmp.ge.s32.totalorder %s2447_s15, 3  ;;  %p237_p5 = scmp.ne.s32.totalorder %s1960_s28, %s1956_s27 }
   0xe   : > { %p238_p6 = scmp.eq.s32.totalorder %s1723_s16, 5  ;;  %p2103_p7 = por %p232_p4, %p231_p2 }
   0xf   : > { %s2449_s15 = smov (%p35_p3, %s2447_s15), 0  ;;  %p1726_p10 = scmp.ge.s32.totalorder %s1984_s12, 1 }
  0x10   : > { %p2107_p8 = por %p238_p6, %p237_p5  ;;  %p216_p9 = scmp.eq.s32.totalorder %s2449_s15, 2 }
  0x11   : > { %p289_p11 = scmp.lt.s32.totalorder %s1984_s12, 7  ;;  %s221_s22 = sadd.s32 1, %s1964_s29 }
  0x12   : > { %s217_s20 = scalar_select %p216_p9, %s2445_s14, 0 }
  0x13   : > { %p290_p12 = pnand %p1726_p10, %p289_p11 }
  0x14   : > { %s218_s21 = ssub.s32 %s215_s17, %s217_s20  ;;  %s2431_s24 = sand.u32 (!%p290_p12), 1, %s1960_s28  }
  0x15   : > { %p219_p13 = scmp.eq.s32.totalorder %s218_s21, 0  ;;  %293 = sbr.rel (%p290_p12) target bundleno = 1291 (0x50b), region = 52 }
  0x16   : > { %p325_p0 = scmp.eq.s32.totalorder (!%p290_p12), %s1972_s9, 1  ;;  %s1727_s25 = sshll.u32 (!%p290_p12), %s2431_s24, 5 }
  0x17   : > { %s2117_s23 = scalar_select %p219_p13, %s1964_s29, %s221_s22  }
  0x18   : > { %p336_p1 = scmp.eq.s32.totalorder (!%p290_p12), %s1972_s9, 0  ;;  %p337_p2 = scmp.eq.s32.totalorder (!%p290_p12), %s1968_s30, 0 }
  0x19   : > { %s2435_s0 = sld [smem:[#allocation11_spill]] (!%p290_p12)  ;;  %s2135_s21 = scalar_lea.vmem (!%p290_p12), [#allocation8], %s1727_s25 }
  0x1a   : > { %s326_s26 = scalar_select %p325_p0, 0, %s1968_s30 }
  0x1b   : > { %p338_p3 = pnand %p337_p2, %p336_p1 }
  0x1c   : > { %p327_p4 = scmp.lt.s32.totalorder %s326_s26, 1 }
  0x1d   : > { %341 = sbr.rel (%p338_p3) target bundleno = 36 (0x24), region = 56 }
  0x1e   : > { %s2451_s26 = smov (!%p327_p4, %s326_s26), 1 }
  0x1f   : > { %s1788_s13 = sshll.u32 %s2451_s26, 5 }
  0x20   : > { %s2133_s20 = scalar_lea.vmem %s2435_s0, %s1788_s13 }
  0x22   : > { %vm342_vm0 = vcmask 7168   ;;  %v1986_v0 = vmov 0.0  }
  0x23   : > { %343 = vst.msk [vmem:[#allocation4] sm:$0xff] %vm342_vm0, %v1986_v0  ;;  %344 = vst.msk [vmem:[#allocation4 + $0x8] sm:$0xff] %vm342_vm0, %v1986_v0 }
  0x24 PF: > { %p1730_p5 = scmp.ne.s32.totalorder %s1972_s9, 0 }
  0x25   : > { %s1789_s26 = sshll.u32 (!%p1730_p5), %s1968_s30, 4 }
  0x26   : > { %347 = sbr.rel (%p1730_p5) target bundleno = 390 (0x186), region = 60  ;;  %s446_s13 = scalar_lea.vmem (!%p1730_p5), [#allocation2], %s1789_s26 }
  0x2b   : > { %v351_v1 = vld [vmem:[%s2133_s20 + $0x18] sm:$0xff]  ;;  %v350_v2 = vld [vmem:[%s2133_s20 + $0x10] sm:$0xff]  ;;  %v349_v3 = vld [vmem:[%s2133_s20 + $0x8] sm:$0xff]  ;;  %v1987_v5 = vmov 0.0   ;;  %vm353_vm1 = vcmask 130048   ;;  %vm433_vm2 = vcmask 7168  }
  0x2c   : > { %385 = vmatprep.subr.mxu0 %v351_v1  ;;  %v348_v4 = vld [vmem:[%s2133_s20] sm:$0xff]  ;;  %421 = vmatprep.mubr.f32.mxu0 %v1987_v5  ;;  %v436_v16 = vld [vmem:[#allocation4 + $0x8] sm:$0xff] }
  0x2d   : > { %386 = vmatpush1.msra.mxu0 %v350_v2  ;;  %v352_v6 = vld [vmem:[%s2423_s1] sm:$0xff] }
  0x2e   : > { %387 = vmatprep.subr.mxu0 %v349_v3  ;;  %v428_v13 = vld [vmem:[#allocation4] sm:$0xff] }
  0x2f   : > { %388 = vmatpush1.msra.mxu0 %v348_v4 }
  0x30   : > { %1731 = vmatmul.mubr.msk.f32.vlgmr.msra.gmra.mxu0 %vm353_vm1, %v352_v6 }
  0xf0   : > { %v423_v7 = vpop.f32.mrf.mxu0 }
  0xf1   : > { %447 = vst [vmem:[%s446_s13] sm:$0xff] %v423_v7  ;;  %v437_v11 = vmul.f32 %v423_v7, %v423_v7 }
  0xf2   : > { %v425_v8 = vpop.f32.mrf.mxu0 }
  0xf3   : > { %v438_v9 = vmul.f32 %v425_v8, %v425_v8  ;;  %448 = vst [vmem:[%s446_s13 + $0x8] sm:$0xff] %v425_v8  ;;  %v429_v10 = vadd.f32 %v425_v8, %v423_v7 }
  0xf5   : > { %430 = vadd.xlane.f32.xlu0 %v429_v10  ;;  %v439_v12 = vadd.f32 %v438_v9, %v437_v11 }
  0xf9   : > { %440 = vadd.xlane.f32.xlu0 %v439_v12 }
 0x17e   : > { %v431_v14 = vpop.xlane.xlu0 %430 }
 0x17f   : > { %v432_v15 = vadd.f32 %v431_v14, %v428_v13 }
 0x181   : > { %434 = vst.msk [vmem:[#allocation4] sm:$0xff] %vm433_vm2, %v432_v15 }
 0x182   : > { %v441_v17 = vpop.xlane.xlu0 %440 }
 0x183   : > { %v442_v18 = vadd.f32 %v441_v17, %v436_v16 }
 0x185   : > { %443 = vst.msk [vmem:[#allocation4 + $0x8] sm:$0xff] %vm433_vm2, %v442_v18 }
 0x186 PF: > { %p450_p6 = pnand %p337_p2, %p325_p0 }
 0x188   : > { %453 = sbr.rel (%p450_p6) target bundleno = 429 (0x1ad), region = 64 }
 0x18d   : > { %v454_v19 = vld [vmem:[#allocation4] sm:$0xff]  ;;  %v457_v20 = vld [vmem:[#allocation4 + $0x8] sm:$0xff]  ;;  %vm466_vm3 = vcmask 7168   ;;  %v1988_v23 = vmov 0.0  }
 0x18e   : > { %v455_v21 = vmul.f32 0.001953125, %v454_v19  ;;  %v458_v22 = vmul.f32 0.001953125, %v457_v20  ;;  %473 = vst.msk [vmem:[#allocation6] sm:$0xff] %vm466_vm3, %v1988_v23  ;;  %474 = vst.msk [vmem:[#allocation6 + $0x8] sm:$0xff] %vm466_vm3, %v1988_v23  ;;  %v462_v28 = vld [vmem:[%s2426_s4] sm:$0xff] }
 0x18f   : > { %475 = vst.msk [vmem:[#allocation6 + $0x10] sm:$0xff] %vm466_vm3, %v1988_v23  ;;  %476 = vst.msk [vmem:[#allocation6 + $0x18] sm:$0xff] %vm466_vm3, %v1988_v23  ;;  %v468_v31 = vld [vmem:[%s2427_s5] sm:$0xff] }
 0x190   : > { %v459_v24 = vmul.f32 %v455_v21, %v455_v21 }
 0x192   : > { %v460_v25 = vsub.f32 %v458_v22, %v459_v24 }
 0x194   : > { %v461_v26 = vmax.f32 %v460_v25, 0.0 }
 0x196   : > { %v463_v27 = vadd.f32 1e-05, %v461_v26 }
 0x198   : > { %1883 = vrsqrt.f32 %v463_v27 }
 0x1a5   : > { %v1884_v29 = vpop.eup %1883 }
 0x1a6   : > { %v465_v30 = vmul.f32 %v1884_v29, %v462_v28 }
 0x1a8   : > { %467 = vst.msk [vmem:[#allocation5] sm:$0xff] %vm466_vm3, %v465_v30  ;;  %v469_v32 = vmul.f32 %v465_v30, %v455_v21 }
 0x1aa   : > { %v470_v33 = vsub.f32 %v468_v31, %v469_v32 }
 0x1ac   : > { %472 = vst.msk [vmem:[#allocation5 + $0x8] sm:$0xff] %vm466_vm3, %v470_v33 }
 0x1ad PF: > { %p1734_p9 = scmp.ne.s32.totalorder %s1972_s9, 1 }
 0x1ae   : > { %s1790_s26 = sshll.u32 (!%p1734_p9), %s1968_s30, 4  ;;  %s1991_s16 = smov (!%p1734_p9), 17  }
 0x1af   : > { %479 = sbr.rel (%p1734_p9) target bundleno = 1076 (0x434), region = 68  ;;  %s482_s13 = scalar_lea.vmem (!%p1734_p9), [#allocation2], %s1790_s26 }
 0x1b0   : > { %s1992_s17 = smov (!%p1734_p9), 16   ;;  %s1993_s22 = smov (!%p1734_p9), 15  }
 0x1b1   : > { %s1994_s25 = smov (!%p1734_p9), 1   ;;  %s1995_s26 = smov (!%p1734_p9), 127  }
 0x1b2   : > { %s1997_s24 = smov (!%p1734_p9), 112  }
 0x1b4   : > { %v485_v34 = vld [vmem:[#allocation5] sm:$0xff]  ;;  %v1989_v35 = vmov 0   ;;  %v494_v36 = vld [vmem:[#allocation5 + $0x8] sm:$0xff]  ;;  %v483_v38 = vld [vmem:[%s482_s13] sm:$0xff]  ;;  %v1990_v46 = vmov 0.0   ;;  %v510_v50 = vlaneseq  ;;  %vm556_vm6 = vcmask 64512  }
 0x1b5   : > { %1885 = vset.pattern.permute.xlu0 %v1989_v35  ;;  %v484_v39 = vld [vmem:[%s482_s13 + $0x8] sm:$0xff]  ;;  %633 = vmatprep.mubr.f32.mxu1 %v1990_v46  ;;  %s1996_s13 = smov 113   ;;  %v1737_v55 = vld [vmem:[%s2425_s3 + $0x2] sm:$0x3]  ;;  %v515_v60 = vld [vmem:[%s2425_s3] sm:$0x3] }
 0x1b6   : > { %488 = vperm.xlu0 %1885, %v485_v34   ;;  %627 = vmatprep.mubr.f32.mxu0 %v1990_v46  ;;  %v518_v51 = vshrl.u32 %v510_v50, 7  ;;  %v2186_v52 = vand.u32 127, %v510_v50  ;;  %v1744_v5 = vld [vmem:[%s2425_s3 + $0x4] sm:$0x3]  ;;  %v1739_v6 = vld [vmem:[%s2424_s2 + $0x18] sm:$0xff]  ;;  %v1738_v7 = vld [vmem:[%s2424_s2 + $0x10] sm:$0xff] }
 0x1b7   : > { %v529_v16 = vld [vmem:[%s2424_s2] sm:$0xff]  ;;  %v1758_v26 = vld [vmem:[%s2425_s3 + $0xa] sm:$0x3]  ;;  %vm1495_vm13 = vcmask 7168  }
 0x1b8   : > { %v2188_v53 = vsub.s32 1, %v518_v51  ;;  %v2190_v54 = vsub.s32 0, %v518_v51  ;;  %vm535_vm4 = vcmp.lt.s32.totalorder %v2186_v52, 16  ;;  %vm512_vm5 = vcmp.lt.s32.totalorder %v2186_v52, 17  ;;  %v1749_v17 = vld [vmem:[%s2425_s3 + $0x6] sm:$0x3] }
 0x1b9   : > { %vm727_vm7 = vcmp.lt.s32.totalorder %v2186_v52, 15  ;;  %vm839_vm8 = vcmp.lt.s32.totalorder %v2186_v52, 1  ;;  %v530_v27 = vld [vmem:[%s2424_s2 + $0x8] sm:$0xff]  ;;  %v1745_v28 = vld [vmem:[%s2424_s2 + $0x20] sm:$0xff]  ;;  %vm1041_vm9 = vcmp.lt.s32.totalorder %v2186_v52, 127  ;;  %vm1153_vm10 = vcmp.lt.s32.totalorder %v2186_v52, 113 }
 0x1ba   : > { %497 = vperm.xlu0 %1885, %v494_v36   ;;  %v548_v58 = vrot.slane %v1737_v55, %v2188_v53  ;;  %v544_v59 = vrot.slane %v1737_v55, %v2190_v54  ;;  %v520_v2 = vrot.slane %v515_v60, %v2190_v54  ;;  %v524_v3 = vrot.slane %v515_v60, %v2188_v53  ;;  %v1763_v36 = vld [vmem:[%s2425_s3 + $0xc] sm:$0x3]  ;;  %v1754_v50 = vld [vmem:[%s2424_s2 + $0x40] sm:$0xff] }
 0x1bb   : > { %v736_v12 = vrot.slane %v1744_v5, %v2190_v54  ;;  %v740_v15 = vrot.slane %v1744_v5, %v2188_v53  ;;  %v848_v24 = vrot.slane %v1749_v17, %v2190_v54  ;;  %v852_v25 = vrot.slane %v1749_v17, %v2188_v53  ;;  %v1775_v17 = vld [vmem:[%s2424_s2 + $0x88] sm:$0xff] }
 0x1bc   : > { %v1050_v32 = vrot.slane %v1758_v26, %v2190_v54  ;;  %v1054_v35 = vrot.slane %v1758_v26, %v2188_v53  ;;  %vm1265_vm11 = vcmp.lt.s32.totalorder %v2186_v52, 112  ;;  %vm1377_vm12 = vcmp.lt.s32.totalorder %v2186_v52, 111 }
 0x231   : > { %v489_v37 = vpop.permute.xlu0 %488 }
 0x232   : > { %v491_v40 = vmul.f32 %v489_v37, %v483_v38  ;;  %v492_v41 = vmul.f32 %v489_v37, %v484_v39  ;;  %v1746_v37 = vld [vmem:[%s2424_s2 + $0x28] sm:$0xff]  ;;  %v1750_v38 = vld [vmem:[%s2424_s2 + $0x30] sm:$0xff] }
 0x235   : > { %v498_v42 = vpop.permute.xlu0 %497 }
 0x236   : > { %v500_v43 = vadd.f32 %v498_v42, %v491_v40  ;;  %v501_v44 = vadd.f32 %v498_v42, %v492_v41 }
 0x238   : > { %v502_v45 = vmul.f32 0.1, %v500_v43  ;;  %v503_v47 = vmul.f32 0.1, %v501_v44 }
 0x23a   : > { %v2166_v48 = vmax.f32 %v500_v43, %v502_v45  ;;  %v2170_v49 = vmax.f32 %v501_v44, %v503_v47  ;;  %v1162_v43 = vrot.slane %v1763_v36, %v2190_v54  ;;  %v1166_v47 = vrot.slane %v1763_v36, %v2188_v53 }
 0x23c   : > { %506 = vrot.lane.b32.xlu0 %v2166_v48, %s1991_s16  ;;  %531 = vrot.lane.b32.xlu1 %v2166_v48, %s1992_s17 }
 0x240   : > { %723 = vrot.lane.b32.xlu0 %v2166_v48, %s1993_s22  ;;  %533 = vrot.lane.b32.xlu1 %v2170_v49, %s1992_s17  ;;  %s1998_s17 = smov 111  }
 0x244   : > { %835 = vrot.lane.b32.xlu0 %v2166_v48, %s1994_s25  ;;  %508 = vrot.lane.b32.xlu1 %v2170_v49, %s1991_s16 }
 0x248   : > { %1037 = vrot.lane.b32.xlu0 %v2166_v48, %s1995_s26  ;;  %725 = vrot.lane.b32.xlu1 %v2170_v49, %s1993_s22 }
 0x24c   : > { %1149 = vrot.lane.b32.xlu0 %v2166_v48, %s1996_s13  ;;  %837 = vrot.lane.b32.xlu1 %v2170_v49, %s1994_s25  ;;  %s1791_s25 = sshll.u32 %s1968_s30, 5 }
 0x250   : > { %1261 = vrot.lane.b32.xlu0 %v2166_v48, %s1997_s24  ;;  %1039 = vrot.lane.b32.xlu1 %v2170_v49, %s1995_s26  ;;  %s1517_s26 = scalar_lea.vmem [#allocation3], %s1791_s25 }
 0x254   : > { %1373 = vrot.lane.b32.xlu0 %v2166_v48, %s1998_s17  ;;  %1151 = vrot.lane.b32.xlu1 %v2170_v49, %s1996_s13 }
 0x258   : > { %1263 = vrot.lane.b32.xlu1 %v2170_v49, %s1997_s24 }
 0x25c   : > { %1375 = vrot.lane.b32.xlu1 %v2170_v49, %s1998_s17 }
 0x2ae   : > { %v507_v56 = vpop.permute.xlu0 %506  ;;  %v532_v57 = vpop.permute.xlu1 %531 }
 0x2b2   : > { %v724_v61 = vpop.permute.xlu0 %723  ;;  %v534_v62 = vpop.permute.xlu1 %533 }
 0x2b3   : > { %v536_v63 = vsel %vm535_vm4, %v532_v57, %v534_v62  ;;  %v537_v0 = vsel %vm535_vm4, %v534_v62, %v532_v57  ;;  %v1773_v62 = vld [vmem:[%s2425_s3 + $0x10] sm:$0x3] }
 0x2b4   : > { %v552_v1 = vmul.f32 %v548_v58, %v536_v63  ;;  %v551_v4 = vmul.f32 %v544_v59, %v537_v0  ;;  %v1755_v63 = vld [vmem:[%s2424_s2 + $0x48] sm:$0xff]  ;;  %v1759_v0 = vld [vmem:[%s2424_s2 + $0x50] sm:$0xff] }
 0x2b6   : > { %v836_v8 = vpop.permute.xlu0 %835  ;;  %593 = vmatprep.subr.mxu0 %v552_v1  ;;  %1794 = vmatprep.subr.mxu1 %v552_v1  ;;  %v509_v9 = vpop.permute.xlu1 %508 }
 0x2b7   : > { %v513_v10 = vsel %vm512_vm5, %v507_v56, %v509_v9  ;;  %v514_v11 = vsel %vm512_vm5, %v509_v9, %v507_v56  ;;  %594 = vmatpush1.msra.mxu0 %v551_v4  ;;  %1795 = vmatpush1.msra.mxu1 %v551_v4  ;;  %v1386_v4 = vrot.slane %v1773_v62, %v2190_v54 }
 0x2b8   : > { %v527_v13 = vmul.f32 %v520_v2, %v514_v11  ;;  %v528_v14 = vmul.f32 %v524_v3, %v513_v10  ;;  %1741 = vmatmul.mubr.msk.f32.vlgmr.msra.gmra.mxu1 %vm556_vm6, %v1739_v6  ;;  %1740 = vmatmul.mubr.msk.f32.vlgmr.msra.gmra.mxu0 %vm556_vm6, %v1738_v7  ;;  %v1390_v7 = vrot.slane %v1773_v62, %v2188_v53 }
 0x2b9   : > { %710 = vmatprep.mubr.f32.mxu1 %v1990_v46  ;;  %818 = vmatprep.mubr.f32.mxu0 %v1990_v46 }
 0x2ba   : > { %676 = vmatprep.subr.mxu1 %v528_v14  ;;  %v726_v18 = vpop.permute.xlu1 %725  ;;  %v1038_v21 = vpop.permute.xlu0 %1037  ;;  %v1769_v14 = vld [vmem:[%s2424_s2 + $0x70] sm:$0xff] }
 0x2bb   : > { %v728_v19 = vsel %vm727_vm7, %v724_v61, %v726_v18  ;;  %v729_v20 = vsel %vm727_vm7, %v726_v18, %v724_v61  ;;  %677 = vmatpush1.msra.mxu1 %v527_v13  ;;  %v1765_v13 = vld [vmem:[%s2424_s2 + $0x68] sm:$0xff] }
 0x2bc   : > { %v743_v22 = vmul.f32 %v736_v12, %v729_v20  ;;  %v744_v23 = vmul.f32 %v740_v15, %v728_v19  ;;  %1742 = vmatmul.mubr.msk.f32.vlgmr.msra.gmra.mxu1 %vm556_vm6, %v529_v16  ;;  %v1770_v15 = vld [vmem:[%s2424_s2 + $0x78] sm:$0xff]  ;;  %v1774_v16 = vld [vmem:[%s2424_s2 + $0x80] sm:$0xff] }
 0x2bd   : > { %716 = vmatprep.mubr.f32.mxu1 %v1990_v46 }
 0x2be   : > { %784 = vmatprep.subr.mxu0 %v744_v23  ;;  %v838_v29 = vpop.permute.xlu1 %837  ;;  %v1150_v39 = vpop.permute.xlu0 %1149 }
 0x2bf   : > { %v840_v30 = vsel %vm839_vm8, %v836_v8, %v838_v29  ;;  %v841_v31 = vsel %vm839_vm8, %v838_v29, %v836_v8  ;;  %785 = vmatpush1.msra.mxu0 %v743_v22  ;;  %v1760_v8 = vld [vmem:[%s2424_s2 + $0x58] sm:$0xff] }
 0x2c0   : > { %v855_v33 = vmul.f32 %v848_v24, %v841_v31  ;;  %v856_v34 = vmul.f32 %v852_v25, %v840_v30  ;;  %1743 = vmatmul.mubr.msk.f32.gmra.mxu1 %vm556_vm6, %v530_v27  ;;  %1747 = vmatmul.mubr.msk.f32.vlgmr.msra.gmra.mxu0 %vm556_vm6, %v1745_v28 }
 0x2c1   : > { %986 = vmatprep.subr.mxu0 %v2170_v49  ;;  %824 = vmatprep.mubr.f32.mxu0 %v1990_v46  ;;  %v1751_v49 = vld [vmem:[%s2424_s2 + $0x38] sm:$0xff] }
 0x2c2   : > { %987 = vmatpush1.msra.mxu0 %v2166_v48  ;;  %896 = vmatprep.subr.mxu1 %v856_v34  ;;  %v1040_v40 = vpop.permute.xlu1 %1039  ;;  %v1768_v48 = vld [vmem:[%s2425_s3 + $0xe] sm:$0x3]  ;;  %v1262_v58 = vpop.permute.xlu0 %1261 }
 0x2c3   : > { %v1042_v41 = vsel %vm1041_vm9, %v1038_v21, %v1040_v40  ;;  %v1043_v42 = vsel %vm1041_vm9, %v1040_v40, %v1038_v21  ;;  %897 = vmatpush1.msra.mxu1 %v855_v33  ;;  %930 = vmatprep.mubr.f32.mxu1 %v1990_v46  ;;  %v1274_v57 = vrot.slane %v1768_v48, %v2190_v54  ;;  %v1764_v54 = vld [vmem:[%s2424_s2 + $0x60] sm:$0xff] }
 0x2c4   : > { %v1057_v44 = vmul.f32 %v1050_v32, %v1042_v41  ;;  %v1058_v45 = vmul.f32 %v1054_v35, %v1043_v42  ;;  %1748 = vmatmul.mubr.msk.f32.gmra.mxu0 %vm556_vm6, %v1746_v37  ;;  %1752 = vmatmul.mubr.msk.f32.vlgmr.msra.gmra.mxu1 %vm556_vm6, %v1750_v38  ;;  %v1278_v61 = vrot.slane %v1768_v48, %v2188_v53 }
 0x2c5   : > { %936 = vmatprep.mubr.f32.mxu1 %v1990_v46  ;;  %1020 = vmatprep.mubr.f32.mxu0 %v1990_v46 }
 0x2c6   : > { %1098 = vmatprep.subr.mxu1 %v1058_v45  ;;  %v1152_v51 = vpop.permute.xlu1 %1151  ;;  %v1374_v9 = vpop.permute.xlu0 %1373 }
 0x2c7   : > { %v1154_v55 = vsel %vm1153_vm10, %v1150_v39, %v1152_v51  ;;  %v1155_v56 = vsel %vm1153_vm10, %v1152_v51, %v1150_v39  ;;  %1099 = vmatpush1.msra.mxu1 %v1057_v44 }
 0x2c8   : > { %v1169_v59 = vmul.f32 %v1162_v43, %v1154_v55  ;;  %v1170_v60 = vmul.f32 %v1166_v47, %v1155_v56  ;;  %1753 = vmatmul.mubr.msk.f32.gmra.mxu1 %vm556_vm6, %v1751_v49  ;;  %1756 = vmatmul.mubr.msk.f32.vlgmr.msra.gmra.mxu0 %vm556_vm6, %v1754_v50 }
 0x2c9   : > { %1026 = vmatprep.mubr.f32.mxu0 %v1990_v46  ;;  %1132 = vmatprep.mubr.f32.mxu1 %v1990_v46 }
 0x2ca   : > { %1210 = vmatprep.subr.mxu0 %v1170_v60  ;;  %v1264_v1 = vpop.permute.xlu1 %1263 }
 0x2cb   : > { %v1266_v2 = vsel %vm1265_vm11, %v1262_v58, %v1264_v1  ;;  %v1267_v3 = vsel %vm1265_vm11, %v1264_v1, %v1262_v58  ;;  %1211 = vmatpush1.msra.mxu0 %v1169_v59 }
 0x2cc   : > { %v1281_v5 = vmul.f32 %v1274_v57, %v1266_v2  ;;  %v1282_v6 = vmul.f32 %v1278_v61, %v1267_v3  ;;  %1757 = vmatmul.mubr.msk.f32.gmra.mxu0 %vm556_vm6, %v1755_v63  ;;  %1761 = vmatmul.mubr.msk.f32.vlgmr.msra.gmra.mxu1 %vm556_vm6, %v1759_v0 }
 0x2cd   : > { %1138 = vmatprep.mubr.f32.mxu1 %v1990_v46  ;;  %1244 = vmatprep.mubr.f32.mxu0 %v1990_v46 }
 0x2ce   : > { %1322 = vmatprep.subr.mxu1 %v1282_v6  ;;  %v1376_v10 = vpop.permute.xlu1 %1375 }
 0x2cf   : > { %v1378_v11 = vsel %vm1377_vm12, %v1374_v9, %v1376_v10  ;;  %v1379_v12 = vsel %vm1377_vm12, %v1376_v10, %v1374_v9  ;;  %1323 = vmatpush1.msra.mxu1 %v1281_v5 }
 0x2d0   : > { %v1393_v52 = vmul.f32 %v1386_v4, %v1378_v11  ;;  %v1394_v53 = vmul.f32 %v1390_v7, %v1379_v12  ;;  %1762 = vmatmul.mubr.msk.f32.gmra.mxu1 %vm556_vm6, %v1760_v8  ;;  %1766 = vmatmul.mubr.msk.f32.vlgmr.msra.gmra.mxu0 %vm556_vm6, %v1764_v54 }
 0x2d1   : > { %1250 = vmatprep.mubr.f32.mxu0 %v1990_v46  ;;  %1356 = vmatprep.mubr.f32.mxu1 %v1990_v46 }
 0x2d2   : > { %1434 = vmatprep.subr.mxu0 %v1394_v53 }
 0x2d3   : > { %1435 = vmatpush1.msra.mxu0 %v1393_v52 }
 0x2d4   : > { %1767 = vmatmul.mubr.msk.f32.gmra.mxu0 %vm556_vm6, %v1765_v13  ;;  %1771 = vmatmul.mubr.msk.f32.vlgmr.msra.gmra.mxu1 %vm556_vm6, %v1769_v14 }
 0x2d5   : > { %1362 = vmatprep.mubr.f32.mxu1 %v1990_v46  ;;  %1468 = vmatprep.mubr.f32.mxu0 %v1990_v46 }
 0x2d8   : > { %1772 = vmatmul.mubr.msk.f32.gmra.mxu1 %vm556_vm6, %v1770_v15  ;;  %1776 = vmatmul.mubr.msk.f32.vlgmr.msra.gmra.mxu0 %vm556_vm6, %v1774_v16 }
 0x2d9   : > { %1474 = vmatprep.mubr.f32.mxu0 %v1990_v46 }
 0x2dc   : > { %1777 = vmatmul.mubr.msk.f32.gmra.mxu0 %vm556_vm6, %v1775_v17 }
 0x378   : > { %v635_v18 = vpop.f32.mrf.mxu1  ;;  %v629_v20 = vpop.f32.mrf.mxu0 }
 0x37a   : > { %v637_v19 = vpop.f32.mrf.mxu1  ;;  %v631_v22 = vpop.f32.mrf.mxu0 }
 0x37c   : > { %v712_v21 = vpop.f32.mrf.mxu1 }
 0x37d   : > { %v713_v35 = vadd.f32 %v712_v21, %v629_v20 }
 0x37e   : > { %v714_v23 = vpop.f32.mrf.mxu1 }
 0x37f   : > { %v715_v38 = vadd.f32 %v714_v23, %v631_v22 }
 0x380   : > { %v718_v24 = vpop.f32.mrf.mxu1  ;;  %v820_v25 = vpop.f32.mrf.mxu0 }
 0x381   : > { %v831_v39 = vadd.f32 %v820_v25, %v713_v35  ;;  %v719_v42 = vadd.f32 %v718_v24, %v635_v18 }
 0x382   : > { %v720_v26 = vpop.f32.mrf.mxu1  ;;  %v822_v27 = vpop.f32.mrf.mxu0 }
 0x383   : > { %v832_v43 = vadd.f32 %v822_v27, %v715_v38  ;;  %v721_v48 = vadd.f32 %v720_v26, %v637_v19  ;;  %v1500_v38 = vld [vmem:[#allocation6 + $0x18] sm:$0xff] }
 0x384   : > { %v826_v28 = vpop.f32.mrf.mxu0  ;;  %v932_v29 = vpop.f32.mrf.mxu1 }
 0x385   : > { %v943_v44 = vadd.f32 %v932_v29, %v831_v39  ;;  %v833_v49 = vadd.f32 %v826_v28, %v719_v42 }
 0x386   : > { %v828_v30 = vpop.f32.mrf.mxu0  ;;  %v934_v46 = vpop.f32.mrf.mxu1 }
 0x387   : > { %v944_v50 = vadd.f32 %v934_v46, %v832_v43  ;;  %v834_v57 = vadd.f32 %v828_v30, %v721_v48  ;;  %v1485_v30 = vld [vmem:[#allocation6] sm:$0xff] }
 0x388   : > { %v938_v31 = vpop.f32.mrf.mxu1  ;;  %v1022_v32 = vpop.f32.mrf.mxu0 }
 0x389   : > { %v1033_v51 = vadd.f32 %v1022_v32, %v943_v44  ;;  %v945_v58 = vadd.f32 %v938_v31, %v833_v49  ;;  %v1499_v32 = vld [vmem:[#allocation6 + $0x10] sm:$0xff] }
 0x38a   : > { %v940_v33 = vpop.f32.mrf.mxu1  ;;  %v1024_v34 = vpop.f32.mrf.mxu0 }
 0x38b   : > { %v1034_v59 = vadd.f32 %v1024_v34, %v944_v50  ;;  %v946_v63 = vadd.f32 %v940_v33, %v834_v57  ;;  %v1486_v33 = vld [vmem:[#allocation6 + $0x8] sm:$0xff] }
 0x38c   : > { %v1028_v36 = vpop.f32.mrf.mxu0  ;;  %v1134_v37 = vpop.f32.mrf.mxu1 }
 0x38d   : > { %v1145_v60 = vadd.f32 %v1134_v37, %v1033_v51  ;;  %v1035_v0 = vadd.f32 %v1028_v36, %v945_v58 }
 0x38e   : > { %v1030_v40 = vpop.f32.mrf.mxu0  ;;  %v1136_v41 = vpop.f32.mrf.mxu1 }
 0x38f   : > { %v1146_v1 = vadd.f32 %v1136_v41, %v1034_v59  ;;  %v1036_v5 = vadd.f32 %v1030_v40, %v946_v63 }
 0x390   : > { %v1140_v45 = vpop.f32.mrf.mxu1  ;;  %v1246_v47 = vpop.f32.mrf.mxu0 }
 0x391   : > { %v1257_v2 = vadd.f32 %v1246_v47, %v1145_v60  ;;  %v1147_v6 = vadd.f32 %v1140_v45, %v1035_v0 }
 0x392   : > { %v1142_v55 = vpop.f32.mrf.mxu1  ;;  %v1248_v56 = vpop.f32.mrf.mxu0 }
 0x393   : > { %v1258_v7 = vadd.f32 %v1248_v56, %v1146_v1  ;;  %v1148_v10 = vadd.f32 %v1142_v55, %v1036_v5 }
 0x394   : > { %v1252_v61 = vpop.f32.mrf.mxu0  ;;  %v1358_v62 = vpop.f32.mrf.mxu1 }
 0x395   : > { %v1369_v8 = vadd.f32 %v1358_v62, %v1257_v2  ;;  %v1259_v11 = vadd.f32 %v1252_v61, %v1147_v6 }
 0x396   : > { %v1254_v3 = vpop.f32.mrf.mxu0  ;;  %v1360_v4 = vpop.f32.mrf.mxu1 }
 0x397   : > { %v1370_v12 = vadd.f32 %v1360_v4, %v1258_v7  ;;  %v1260_v14 = vadd.f32 %v1254_v3, %v1148_v10 }
 0x398   : > { %v1364_v54 = vpop.f32.mrf.mxu1  ;;  %v1470_v9 = vpop.f32.mrf.mxu0 }
 0x399   : > { %v1481_v52 = vadd.f32 %v1470_v9, %v1369_v8  ;;  %v1371_v15 = vadd.f32 %v1364_v54, %v1259_v11 }
 0x39a   : > { %v1366_v53 = vpop.f32.mrf.mxu1  ;;  %v1472_v13 = vpop.f32.mrf.mxu0 }
 0x39b   : > { %1518 = vst [vmem:[%s1517_s26] sm:$0xff] %v1481_v52  ;;  %v1482_v16 = vadd.f32 %v1472_v13, %v1370_v12  ;;  %v1372_v18 = vadd.f32 %v1366_v53, %v1260_v14  ;;  %v1501_v24 = vmul.f32 %v1481_v52, %v1481_v52 }
 0x39c   : > { %v1476_v17 = vpop.f32.mrf.mxu0 }
 0x39d   : > { %1519 = vst [vmem:[%s1517_s26 + $0x8] sm:$0xff] %v1482_v16  ;;  %v1483_v19 = vadd.f32 %v1476_v17, %v1371_v15  ;;  %v1487_v20 = vadd.f32 %v1482_v16, %v1481_v52  ;;  %v1502_v21 = vmul.f32 %v1482_v16, %v1482_v16 }
 0x39e   : > { %v1478_v22 = vpop.f32.mrf.mxu0 }
 0x39f   : > { %1520 = vst [vmem:[%s1517_s26 + $0x10] sm:$0xff] %v1483_v19  ;;  %v1484_v23 = vadd.f32 %v1478_v22, %v1372_v18  ;;  %1488 = vadd.xlane.f32.xlu0 %v1487_v20  ;;  %v1505_v25 = vadd.f32 %v1502_v21, %v1501_v24  ;;  %v1503_v28 = vmul.f32 %v1483_v19, %v1483_v19 }
 0x3a1   : > { %1521 = vst [vmem:[%s1517_s26 + $0x18] sm:$0xff] %v1484_v23  ;;  %v1490_v26 = vadd.f32 %v1484_v23, %v1483_v19  ;;  %v1504_v27 = vmul.f32 %v1484_v23, %v1484_v23 }
 0x3a3   : > { %1506 = vadd.xlane.f32.xlu0 %v1505_v25  ;;  %1491 = vadd.xlane.f32.xlu1 %v1490_v26  ;;  %v1508_v29 = vadd.f32 %v1504_v27, %v1503_v28 }
 0x3a7   : > { %1509 = vadd.xlane.f32.xlu0 %v1508_v29 }
 0x428   : > { %v1489_v46 = vpop.xlane.xlu0 %1488 }
 0x429   : > { %v1493_v31 = vadd.f32 %v1489_v46, %v1485_v30 }
 0x42b   : > { %1496 = vst.msk [vmem:[#allocation6] sm:$0xff] %vm1495_vm13, %v1493_v31 }
 0x42c   : > { %v1507_v34 = vpop.xlane.xlu0 %1506  ;;  %v1492_v35 = vpop.xlane.xlu1 %1491 }
 0x42d   : > { %v1511_v36 = vadd.f32 %v1507_v34, %v1499_v32  ;;  %v1494_v37 = vadd.f32 %v1492_v35, %v1486_v33 }
 0x42f   : > { %1513 = vst.msk [vmem:[#allocation6 + $0x10] sm:$0xff] %vm1495_vm13, %v1511_v36  ;;  %1497 = vst.msk [vmem:[#allocation6 + $0x8] sm:$0xff] %vm1495_vm13, %v1494_v37 }
 0x430   : > { %v1510_v39 = vpop.xlane.xlu0 %1509 }
 0x431   : > { %v1512_v40 = vadd.f32 %v1510_v39, %v1500_v38 }
 0x433   : > { %1514 = vst.msk [vmem:[#allocation6 + $0x18] sm:$0xff] %vm1495_vm13, %v1512_v40 }
 0x434 PF: > { %p1522_p10 = scmp.eq.s32.totalorder %s1972_s9, 2 }
 0x436   : > { %p1523_p11 = pnand %p1522_p10, %p337_p2 }
 0x438   : > { %1526 = sbr.rel (%p1523_p11) target bundleno = 1118 (0x45e), region = 72 }
 0x43d   : > { %v1527_v41 = vld [vmem:[#allocation6] sm:$0xff]  ;;  %v1532_v42 = vld [vmem:[#allocation6 + $0x10] sm:$0xff]  ;;  %v1528_v45 = vld [vmem:[#allocation6 + $0x8] sm:$0xff]  ;;  %vm1550_vm14 = vcmask 7168  }
 0x43e   : > { %v1529_v43 = vmul.f32 0.001953125, %v1527_v41  ;;  %v1534_v44 = vmul.f32 0.001953125, %v1532_v42  ;;  %v1533_v47 = vld [vmem:[#allocation6 + $0x18] sm:$0xff]  ;;  %v1530_v48 = vmul.f32 0.001953125, %v1528_v45  ;;  %v1542_v61 = vld [vmem:[%s2428_s6] sm:$0xff]  ;;  %v1543_v62 = vld [vmem:[%s2428_s6 + $0x8] sm:$0xff] }
 0x43f   : > { %v1535_v49 = vmul.f32 0.001953125, %v1533_v47  ;;  %v1553_v3 = vld [vmem:[%s2429_s7] sm:$0xff]  ;;  %v1554_v5 = vld [vmem:[%s2429_s7 + $0x8] sm:$0xff] }
 0x440   : > { %v1536_v50 = vmul.f32 %v1529_v43, %v1529_v43  ;;  %v1537_v51 = vmul.f32 %v1530_v48, %v1530_v48 }
 0x442   : > { %v1538_v55 = vsub.f32 %v1534_v44, %v1536_v50  ;;  %v1539_v56 = vsub.f32 %v1535_v49, %v1537_v51 }
 0x444   : > { %v1540_v57 = vmax.f32 %v1538_v55, 0.0  ;;  %v1541_v58 = vmax.f32 %v1539_v56, 0.0 }
 0x446   : > { %v1544_v59 = vadd.f32 1e-05, %v1540_v57  ;;  %v1545_v60 = vadd.f32 1e-05, %v1541_v58 }
 0x448   : > { %1886 = vrsqrt.f32 %v1544_v59 }
 0x449   : > { %1888 = vrsqrt.f32 %v1545_v60 }
 0x455   : > { %v1887_v63 = vpop.eup %1886 }
 0x456   : > { %v1889_v0 = vpop.eup %1888  ;;  %v1548_v1 = vmul.f32 %v1887_v63, %v1542_v61 }
 0x457   : > { %v1549_v2 = vmul.f32 %v1889_v0, %v1543_v62 }
 0x458   : > { %1551 = vst.msk [vmem:[#allocation7] sm:$0xff] %vm1550_vm14, %v1548_v1  ;;  %v1555_v4 = vmul.f32 %v1548_v1, %v1529_v43 }
 0x459   : > { %1552 = vst.msk [vmem:[#allocation7 + $0x8] sm:$0xff] %vm1550_vm14, %v1549_v2  ;;  %v1556_v6 = vmul.f32 %v1549_v2, %v1530_v48 }
 0x45a   : > { %v1557_v7 = vsub.f32 %v1553_v3, %v1555_v4 }
 0x45b   : > { %v1558_v8 = vsub.f32 %v1554_v5, %v1556_v6 }
 0x45c   : > { %1560 = vst.msk [vmem:[#allocation7 + $0x10] sm:$0xff] %vm1550_vm14, %v1557_v7 }
 0x45d   : > { %1561 = vst.msk [vmem:[#allocation7 + $0x18] sm:$0xff] %vm1550_vm14, %v1558_v8 }
 0x45e PF: > { %p1780_p12 = scmp.ne.s32.totalorder %s1972_s9, 2 }
 0x45f   : > { %s1792_s0 = sshll.u32 (!%p1780_p12), %s1968_s30, 5 }
 0x460   : > { %1564 = sbr.rel (%p1780_p12) target bundleno = 1266 (0x4f2), region = 76  ;;  %s1567_s13 = scalar_lea.vmem (!%p1780_p12), [#allocation3], %s1792_s0 }
 0x465   : > { %v1589_v54 = vld [vmem:[#allocation7 + $0x10] sm:$0xff]  ;;  %v1572_v9 = vld [vmem:[#allocation7] sm:$0xff]  ;;  %v1999_v10 = vmov 0   ;;  %v1590_v11 = vld [vmem:[#allocation7 + $0x18] sm:$0xff] }
 0x466   : > { %1891 = vset.pattern.permute.xlu1 %v1999_v10  ;;  %1890 = vset.pattern.permute.xlu0 %v1999_v10  ;;  %v1573_v12 = vld [vmem:[#allocation7 + $0x8] sm:$0xff]  ;;  %v1568_v52 = vld [vmem:[%s1567_s13] sm:$0xff]  ;;  %v1570_v17 = vld [vmem:[%s1567_s13 + $0x10] sm:$0xff] }
 0x467   : > { %1593 = vperm.xlu1 %1891, %v1589_v54   ;;  %1576 = vperm.xlu0 %1890, %v1572_v9   ;;  %v1569_v53 = vld [vmem:[%s1567_s13 + $0x8] sm:$0xff]  ;;  %v1571_v18 = vld [vmem:[%s1567_s13 + $0x18] sm:$0xff]  ;;  %v1613_v26 = vld [vmem:[%s2133_s20] sm:$0xff] }
 0x468   : > { %v1614_v27 = vld [vmem:[%s2133_s20 + $0x8] sm:$0xff]  ;;  %v1615_v36 = vld [vmem:[%s2133_s20 + $0x10] sm:$0xff]  ;;  %v1616_v37 = vld [vmem:[%s2133_s20 + $0x18] sm:$0xff] }
 0x46b   : > { %1598 = vperm.xlu1 %1891, %v1590_v11   ;;  %1581 = vperm.xlu0 %1890, %v1573_v12  }
 0x4e2   : > { %v1594_v13 = vpop.permute.xlu1 %1593  ;;  %v1577_v14 = vpop.permute.xlu0 %1576 }
 0x4e3   : > { %v1584_v15 = vmul.f32 %v1577_v14, %v1568_v52  ;;  %v1585_v16 = vmul.f32 %v1577_v14, %v1569_v53 }
 0x4e5   : > { %v1601_v19 = vadd.f32 %v1594_v13, %v1584_v15  ;;  %v1602_v20 = vadd.f32 %v1594_v13, %v1585_v16 }
 0x4e6   : > { %v1582_v21 = vpop.permute.xlu0 %1581  ;;  %v1599_v28 = vpop.permute.xlu1 %1598 }
 0x4e7   : > { %v1605_v22 = vmul.f32 0.1, %v1601_v19  ;;  %v1606_v23 = vmul.f32 0.1, %v1602_v20  ;;  %v1586_v24 = vmul.f32 %v1582_v21, %v1570_v17  ;;  %v1587_v25 = vmul.f32 %v1582_v21, %v1571_v18 }
 0x4e9   : > { %v1609_v29 = vmax.f32 %v1601_v19, %v1605_v22  ;;  %v1610_v30 = vmax.f32 %v1602_v20, %v1606_v23  ;;  %v1603_v46 = vadd.f32 %v1599_v28, %v1586_v24  ;;  %v1604_v31 = vadd.f32 %v1599_v28, %v1587_v25 }
 0x4eb   : > { %v1617_v32 = vadd.f32 %v1613_v26, %v1609_v29  ;;  %v1618_v33 = vadd.f32 %v1614_v27, %v1610_v30  ;;  %v1607_v34 = vmul.f32 0.1, %v1603_v46  ;;  %v1608_v35 = vmul.f32 0.1, %v1604_v31 }
 0x4ed   : > { %1621 = vst [vmem:[%s2135_s21] sm:$0xff] %v1617_v32  ;;  %1622 = vst [vmem:[%s2135_s21 + $0x8] sm:$0xff] %v1618_v33  ;;  %v1611_v38 = vmax.f32 %v1603_v46, %v1607_v34  ;;  %v1612_v39 = vmax.f32 %v1604_v31, %v1608_v35 }
 0x4ef   : > { %v1619_v40 = vadd.f32 %v1615_v36, %v1611_v38  ;;  %v1620_v41 = vadd.f32 %v1616_v37, %v1612_v39 }
 0x4f1   : > { %1623 = vst [vmem:[%s2135_s21 + $0x10] sm:$0xff] %v1619_v40  ;;  %1624 = vst [vmem:[%s2135_s21 + $0x18] sm:$0xff] %v1620_v41 }
 0x4f2 PF: > { %s1641_s17 = sshll.u32 %s2135_s21, 4  ;;  %s2453_s30 = smov (!%p1522_p10, %s1968_s30), 0  ;;  %s2362_s17 = int_to_ptr.vmem [resolvable:$true] %s1641_s17 }
 0x4f3   : > { %s1793_s20 = sshll.u32 %s2453_s30, 9  ;;  %s2436_s25 = sand.u32 1, %s1960_s28  }
 0x4f4   : > { %s2367_s24 = scalar_lea.hbm %s2430_s8, %s1793_s20  ;;  %s2371_s26 = scalar_lea.sflag [#allocation9], %s2436_s25 }
 0x4f5   : > { %s1892_s0 = scalar_lea.vmem %s2362_s17, 512  ;;  %s2000_s9 = smov [#allocation8]  }
 0x4f6   : > { %p1893_p13 = scmp.ne.s32.totalorder %s2362_s17, %s1892_s0  ;;  %s1896_s21 = sshll.u32 %s2000_s9, 4  ;;  %s1897_s21 = int_to_ptr.vmem [resolvable:$false] %s1896_s21 }
 0x4f7   : > { %s1898_s13 = scalar_lea.vmem %s1897_s21, 1024  ;;  %p1899_p2 = scmp.lt.s32.totalorder %s2362_s17, %s1897_s21 }
 0x4f8   : > { %p1894_p0 = pnand %p1893_p13, %p2103_p7  ;;  %p1900_p3 = scmp.lt.s32.totalorder %s1898_s13, %s1892_s0 }
 0x4fa   : > { %p1895_p1 = pneg %p1894_p0  ;;  %p1901_p4 = por %p1900_p3, %p1899_p2 }
 0x4fc   : > { %p1902_p5 = pnand %p1901_p4, %p1895_p1 }
 0x4fe   : > { %1905 = shalt.err (!%p1902_p5)
}
 0x4ff   : > { %s1906_s30 = scalar_lea.hbm %s2367_s24, 512  ;;  %s1910_s22 = scalar_lea.hbm %s2430_s8, 1024 }
 0x500   : > { %p1907_p6 = scmp.ne.s32.totalorder %s2367_s24, %s1906_s30  ;;  %p1911_p11 = scmp.lt.s32.totalorder %s2367_s24, %s2430_s8 }
 0x501   : > { %p1912_p12 = scmp.lt.s32.totalorder %s1910_s22, %s1906_s30 }
 0x502   : > { %p1908_p9 = pnand %p1907_p6, %p2103_p7 }
 0x503   : > { %p1913_p13 = por %p1912_p12, %p1911_p11 }
 0x504   : > { %p1909_p10 = pneg %p1908_p9 }
 0x506   : > { %p1914_p0 = pnand %p1913_p13, %p1909_p10 }
 0x508   : > { %1917 = shalt.err (!%p1914_p0)
}
 0x509   : > { %s2001_s0 = smov 256   ;;  %s2002_s21 = smov 16  }
 0x50a   : > { %1796 = dma.vmem_to_hbm [thread:$0]  (%p2103_p7), %s2362_s17, 512, %s2367_s24, %s2371_s26, %s2001_s0, %s2001_s0, %s2002_s21  }
 0x50b PF: > { %p1802_p1 = scmp.ge.s32.totalorder %s1984_s12, 2  ;;  %s1656_s13 = sand.u32 1, %s1956_s27  }
 0x50c   : > { %s1657_s30 = scalar_lea.sflag [#allocation9], %s1656_s13 }
 0x50d   : > { %p1799_p2 = pnand %p1802_p1, %p2107_p8 }
 0x50f   : > { %p1800_p3 = pneg %p1799_p2 }
 0x511   : > { %1951 = dma.done.wait (%p1800_p3), %s1657_s30, 512  }
 0x512   : > { %1953 = vsyncadd (%p1800_p3), %s1657_s30, 4294966784  ;;  %s21_s12 = sadd.s32 1, %s1984_s12   ;;  %s2437_s27 = smov %s1960_s28 }
 0x513   : > { %p18_p4 = scmp.ge.s32.totalorder %s21_s12, 8   ;;  %s2438_s28 = smov %s1964_s29 }
 0x514   : > { %s2439_s29 = smov %s2117_s23  ;;  %s2440_s30 = smov %s1976_s10 }
 0x515   : > { %s2441_s9 = smov %s1980_s11  ;;  %s2442_s10 = smov %s2445_s14 }
 0x516   : > { %s2443_s11 = smov %s2449_s15  ;;  %20 = sbr.rel (!%p18_p4) target bundleno = 7 (0x7), region = 138 }
 0x51b   :  { %1662 = vsyncpa [#allocation9], 1 }
 0x51c   :  { %1664 = vsyncpa [#allocation9 + $0x1], 1 }

</bundles_post_ra>
